<compile_context>
chip_gen: v6e
topology: v6e:2x2x1
jax: 0.10.0
libtpu: 0.0.40
codegen_flags: <defaults>
</compile_context>

<pallas_src>
import functools

import numpy as np

import jax
import jax.numpy as jnp
from jax import lax
from jax.experimental import pallas as pl
from jax.experimental.pallas import tpu as pltpu


def _same_pad(k):
    # "same" padding for stride=1: total = k - 1, low = total // 2 (matches F.pad order).
    total = k - 1
    return total // 2, total - total // 2


def _halo(k, W):
    lo, hi = _same_pad(k)
    return lo * W + lo, hi * W + hi


def _conv_masks(H, W, K):
    """(K*K, H*W) f32 validity masks for a stride-1 'same' KxK conv on a
    row-major-flattened (H, W) grid: 1.0 where the shifted tap reads a real
    pixel, 0.0 where it would read padding."""
    lo, _ = _same_pad(K)
    hs, ws = np.meshgrid(np.arange(H), np.arange(W), indexing="ij")
    hs = hs.reshape(-1)
    ws = ws.reshape(-1)
    masks = np.zeros((K * K, H * W), np.float32)
    for kh in range(K):
        for kw in range(K):
            dh, dw = kh - lo, kw - lo
            valid = ((hs + dh >= 0) & (hs + dh < H) &
                     (ws + dw >= 0) & (ws + dw < W))
            masks[kh * K + kw] = valid.astype(np.float32)
    return jnp.asarray(masks)


# ---------------------------------------------------------------------------
# Fused MBConv kernel (one grid step = one image, everything VMEM-resident)
# ---------------------------------------------------------------------------
def _mbconv_kernel(x_ref, mk_ref, m3_ref,
                   ew_ref, esc_ref, esh_ref,
                   dwt_ref, pw_ref, dsc_ref, dsh_ref,
                   w1_ref, b1_ref, w2_ref, b2_ref,
                   prw_ref, psc_ref, psh_ref,
                   o_ref,
                   ext1_ref, ext2_ref, ext3_ref,
                   *, K, H, W, resi):
    HW = H * W

    def shifted_taps(ext_ref, val, kk, mask_ref):
        # Zero-extend `val` (C, HW) along the flat spatial axis in a VMEM halo
        # scratch, then read the kk*kk statically-shifted, boundary-masked taps.
        lo, _ = _same_pad(kk)
        lp = lo * W + lo
        ext_ref[...] = jnp.zeros_like(ext_ref)   # re-zeroed each grid step (megacore-safe)
        ext_ref[:, lp:lp + HW] = val
        taps = []
        for kh in range(kk):
            for kw in range(kk):
                t = kh * kk + kw
                a = lp + (kh - lo) * W + (kw - lo)       # static lane offset
                taps.append(ext_ref[:, a:a + HW] * mask_ref[t:t + 1, :])
        return taps

    x = x_ref[0]                                                       # (Cin, HW)

    # ---- expand: KxK conv as a single im2col MXU matmul + folded BN + Swish --
    px = jnp.concatenate(shifted_taps(ext1_ref, x, K, mk_ref), axis=0)  # (Cin*K*K, HW)
    h = jnp.dot(ew_ref[...], px, preferred_element_type=jnp.float32)    # (Cmid, HW)
    h = h * esc_ref[...] + esh_ref[...]
    h = h * jax.nn.sigmoid(h)

    # ---- depthwise 3x3 (VPU tap-sum) + pointwise 1x1 matmul + folded BN ------
    taps = shifted_taps(ext2_ref, h, 3, m3_ref)
    d = taps[0] * dwt_ref[:, 0:1]
    for t in range(1, 9):
        d = d + taps[t] * dwt_ref[:, t:t + 1]
    p = jnp.dot(pw_ref[...], d, preferred_element_type=jnp.float32)     # (Cmid, HW)
    p = p * dsc_ref[...] + dsh_ref[...]

    # ---- squeeze & excite (gate applied while activation is still in VMEM) ---
    s = jnp.sum(p, axis=1, keepdims=True) * (1.0 / HW)                  # (Cmid, 1)
    z = jnp.sum(w1_ref[...] * s, axis=0, keepdims=True) + b1_ref[...]   # (1, Sq)
    z = z * jax.nn.sigmoid(z)
    g = jnp.sum(w2_ref[...] * z, axis=1, keepdims=True) + b2_ref[...]   # (Cmid, 1)
    p = p * jax.nn.sigmoid(g)

    # ---- project: KxK conv (im2col matmul) + folded BN (+ residual) ----------
    pp = jnp.concatenate(shifted_taps(ext3_ref, p, K, mk_ref), axis=0)  # (Cmid*K*K, HW)
    out = jnp.dot(prw_ref[...], pp, preferred_element_type=jnp.float32)  # (Cout, HW)
    out = out * psc_ref[...] + psh_ref[...]
    if resi:
        out = out + x
    o_ref[0] = out.astype(o_ref.dtype)


# ---------------------------------------------------------------------------
# Parameter prep: fold conv biases into BN scale/shift, lay weights out for
# the (C, H*W) lane-dense kernel.
# ---------------------------------------------------------------------------
def _prep_kernel_params(p, eps=1e-3):
    def fold(stats, bias):
        g, b, m, v = stats
        sc = g / jnp.sqrt(v + eps)
        sh = b + sc * (bias - m)
        return sc[:, None], sh[:, None]                  # (C, 1) columns

    cmid = p["dw_w"].shape[0]
    cout = p["proj_w"].shape[-1]
    kp = {}
    kp["ew"] = jnp.transpose(p["exp_w"], (3, 0, 1, 2)).reshape(cmid, -1)   # (Cmid, Cin*K*K)
    kp["e_scale"], kp["e_shift"] = fold(p["exp_bn"], p["exp_b"])
    kp["dw"] = p["dw_w"]                                                    # (Cmid, 9)
    kp["pw"] = p["pw_w"]                                                    # (Cmid, Cmid) out,in
    kp["d_scale"], kp["d_shift"] = fold(p["dw_bn"], p["pw_b"])
    kp["w1t"] = p["se_w1"].T                                                # (Cmid, Sq)
    kp["b1"] = p["se_b1"][None, :]                                          # (1, Sq)
    kp["w2"] = p["se_w2"]                                                   # (Cmid, Sq)
    kp["b2"] = p["se_b2"][:, None]                                          # (Cmid, 1)
    kp["prw"] = jnp.transpose(p["proj_w"], (3, 0, 1, 2)).reshape(cout, -1)  # (Cout, Cmid*K*K)
    kp["p_scale"], kp["p_shift"] = fold(p["proj_bn"], p["proj_b"])
    return kp


def mbconv_forward(x_nchw, params, *, kernel_size, resi):
    N, Cin, H, W = x_nchw.shape
    K = kernel_size
    HW = H * W
    kp = _prep_kernel_params(params)
    Cmid = kp["dw"].shape[0]
    Cout = kp["prw"].shape[0]

    lK, rK = _halo(K, W)
    l3, r3 = _halo(3, W)

    weights = [
        _conv_masks(H, W, K), _conv_masks(H, W, 3),
        kp["ew"], kp["e_scale"], kp["e_shift"],
        kp["dw"], kp["pw"], kp["d_scale"], kp["d_shift"],
        kp["w1t"], kp["b1"], kp["w2"], kp["b2"],
        kp["prw"], kp["p_scale"], kp["p_shift"],
    ]

    kern = functools.partial(_mbconv_kernel, K=K, H=H, W=W, resi=resi)
    in_specs = ([pl.BlockSpec((1, Cin, HW), lambda n: (n, 0, 0))]
                + [pl.BlockSpec(w.shape, lambda n: (0, 0)) for w in weights])

    out_flat = pl.pallas_call(
        kern,
        out_shape=jax.ShapeDtypeStruct((N, Cout, HW), x_nchw.dtype),
        grid=(N,),
        in_specs=in_specs,
        out_specs=pl.BlockSpec((1, Cout, HW), lambda n: (n, 0, 0)),
        scratch_shapes=[
            pltpu.VMEM((Cin, lK + HW + rK), jnp.float32),   # halo for expand conv
            pltpu.VMEM((Cmid, l3 + HW + r3), jnp.float32),  # halo for depthwise 3x3
            pltpu.VMEM((Cmid, lK + HW + rK), jnp.float32),  # halo for project conv
        ],
        compiler_params=pltpu.CompilerParams(
            dimension_semantics=("parallel",),
        ),
    )(x_nchw.reshape(N, Cin, HW), *weights)
    return out_flat.reshape(N, Cout, H, W)


# ---------------------------------------------------------------------------
# Deterministic synthetic parameters + pure-JAX reference (PyTorch semantics)
# ---------------------------------------------------------------------------
def init_params(key, cin, cout, expand, k, se_ratio):
    mid = cin * expand
    sq = max(int(cin * se_ratio), 1)
    ks = jax.random.split(key, 24)
    u = lambda kk, shape, s=0.2: jax.random.uniform(kk, shape, jnp.float32, -s, s)

    def bn_stats(i, c):
        return (1.0 + u(ks[i], (c,), 0.1), u(ks[i + 1], (c,), 0.1),
                u(ks[i + 2], (c,), 0.1), 1.0 + u(ks[i + 3], (c,), 0.1))

    p = {}
    p["exp_w"] = u(ks[0], (k, k, cin, mid))         # HWIO
    p["exp_b"] = u(ks[1], (mid,))
    p["exp_bn"] = bn_stats(2, mid)
    p["dw_w"] = u(ks[6], (mid, 9))                  # depthwise taps (C, 3*3)
    p["pw_w"] = u(ks[7], (mid, mid))                # pointwise (out, in)
    p["pw_b"] = u(ks[8], (mid,))
    p["dw_bn"] = bn_stats(9, mid)
    p["se_w1"] = u(ks[13], (sq, mid))               # squeeze (out, in)
    p["se_b1"] = u(ks[14], (sq,))
    p["se_w2"] = u(ks[15], (mid, sq))               # excite (out, in)
    p["se_b2"] = u(ks[16], (mid,))
    p["proj_w"] = u(ks[17], (k, k, mid, cout))      # HWIO
    p["proj_b"] = u(ks[18], (cout,))
    p["proj_bn"] = bn_stats(19, cout)
    return p


def mbconv_reference(x_nchw, params, *, kernel_size, resi, eps=1e-3):
    x = jnp.transpose(x_nchw, (0, 2, 3, 1))
    dn = ("NHWC", "HWIO", "NHWC")
    pad = _same_pad(kernel_size)

    def bn(y, stats):
        g, b, m, v = stats
        return (y - m) * (g / jnp.sqrt(v + eps)) + b

    h = lax.conv_general_dilated(x, params["exp_w"], (1, 1), [pad, pad],
                                 dimension_numbers=dn) + params["exp_b"]
    h = bn(h, params["exp_bn"])
    h = h * jax.nn.sigmoid(h)

    cmid = h.shape[-1]
    dw_hwio = params["dw_w"].T.reshape(3, 3, 1, cmid)
    d = lax.conv_general_dilated(h, dw_hwio, (1, 1), [_same_pad(3)] * 2,
                                 dimension_numbers=dn, feature_group_count=cmid)
    p = jnp.einsum("nhwc,oc->nhwo", d, params["pw_w"]) + params["pw_b"]
    p = bn(p, params["dw_bn"])

    s = jnp.mean(p, axis=(1, 2))                                       # (N, Cmid)
    z = jnp.einsum("nc,jc->nj", s, params["se_w1"]) + params["se_b1"]
    z = z * jax.nn.sigmoid(z)
    g = jnp.einsum("nj,cj->nc", z, params["se_w2"]) + params["se_b2"]
    p = p * jax.nn.sigmoid(g)[:, None, None, :]

    o = lax.conv_general_dilated(p, params["proj_w"], (1, 1), [pad, pad],
                                 dimension_numbers=dn) + params["proj_b"]
    o = bn(o, params["proj_bn"])
    o = jnp.transpose(o, (0, 3, 1, 2))
    if resi:
        o = o + x_nchw
    return o


if __name__ == "__main__":
    key = jax.random.PRNGKey(0)
    kx, kparams = jax.random.split(key)

    # MBConv(in_channels=4, out_channels=4, expand=2, kernel_size=3, stride=1, se_ratio=0.25)
    N, Cin, H, W = 2, 4, 16, 16
    Cout, expand, K, stride, se_ratio = 4, 2, 3, 1, 0.25
    resi = (stride == 1) and (Cin == Cout)

    x = jax.random.normal(kx, (N, Cin, H, W), jnp.float32)
    params = init_params(kparams, Cin, Cout, expand, K, se_ratio)

    fwd = jax.jit(functools.partial(mbconv_forward, kernel_size=K, resi=resi))
    out = jax.block_until_ready(fwd(x, params))
    assert out.shape == (N, Cout, H, W)

    ref = mbconv_reference(x, params, kernel_size=K, resi=resi)
    err = float(jnp.max(jnp.abs(out - ref)))
    assert err < 5e-3, f"mismatch vs reference: max abs err = {err}"

    print("KERNEL_OK")
</pallas_src>

<mosaic_0001>
module attributes {stable_mosaic.version = 11 : i64} {
  func.func @_mbconv_kernel(%arg0: i32, %arg1: memref<1x4x256xf32, #tpu.memory_space<vmem>>, %arg2: memref<9x256xf32, #tpu.memory_space<vmem>>, %arg3: memref<9x256xf32, #tpu.memory_space<vmem>>, %arg4: memref<8x36xf32, #tpu.memory_space<vmem>>, %arg5: memref<8x1xf32, #tpu.memory_space<vmem>>, %arg6: memref<8x1xf32, #tpu.memory_space<vmem>>, %arg7: memref<8x9xf32, #tpu.memory_space<vmem>>, %arg8: memref<8x8xf32, #tpu.memory_space<vmem>>, %arg9: memref<8x1xf32, #tpu.memory_space<vmem>>, %arg10: memref<8x1xf32, #tpu.memory_space<vmem>>, %arg11: memref<8x1xf32, #tpu.memory_space<vmem>>, %arg12: memref<1x1xf32, #tpu.memory_space<vmem>>, %arg13: memref<8x1xf32, #tpu.memory_space<vmem>>, %arg14: memref<8x1xf32, #tpu.memory_space<vmem>>, %arg15: memref<4x72xf32, #tpu.memory_space<vmem>>, %arg16: memref<4x1xf32, #tpu.memory_space<vmem>>, %arg17: memref<4x1xf32, #tpu.memory_space<vmem>>, %arg18: memref<1x4x256xf32, #tpu.memory_space<vmem>>, %arg19: memref<4x290xf32, #tpu.memory_space<vmem>>, %arg20: memref<8x290xf32, #tpu.memory_space<vmem>>, %arg21: memref<8x290xf32, #tpu.memory_space<vmem>>) attributes {dimension_semantics = [#tpu.dimension_semantics<parallel>], iteration_bounds = array<i64: 2>, scalar_prefetch = 0 : i64, scratch_operands = 3 : i64, tpu.core_type = #tpu.core_type<tc>, window_params = [{transform_indices = @transform_0, window_bounds = array<i64: 1, 4, 256>}, {pipeline_mode = #tpu.pipeline_mode<synchronous>, transform_indices = @transform_1, window_bounds = array<i64: 9, 256>}, {pipeline_mode = #tpu.pipeline_mode<synchronous>, transform_indices = @transform_2, window_bounds = array<i64: 9, 256>}, {pipeline_mode = #tpu.pipeline_mode<synchronous>, transform_indices = @transform_3, window_bounds = array<i64: 8, 36>}, {pipeline_mode = #tpu.pipeline_mode<synchronous>, transform_indices = @transform_4, window_bounds = array<i64: 8, 1>}, {pipeline_mode = #tpu.pipeline_mode<synchronous>, transform_indices = @transform_5, window_bounds = array<i64: 8, 1>}, {pipeline_mode = #tpu.pipeline_mode<synchronous>, transform_indices = @transform_6, window_bounds = array<i64: 8, 9>}, {pipeline_mode = #tpu.pipeline_mode<synchronous>, transform_indices = @transform_7, window_bounds = array<i64: 8, 8>}, {pipeline_mode = #tpu.pipeline_mode<synchronous>, transform_indices = @transform_8, window_bounds = array<i64: 8, 1>}, {pipeline_mode = #tpu.pipeline_mode<synchronous>, transform_indices = @transform_9, window_bounds = array<i64: 8, 1>}, {pipeline_mode = #tpu.pipeline_mode<synchronous>, transform_indices = @transform_10, window_bounds = array<i64: 8, 1>}, {pipeline_mode = #tpu.pipeline_mode<synchronous>, transform_indices = @transform_11, window_bounds = array<i64: 1, 1>}, {pipeline_mode = #tpu.pipeline_mode<synchronous>, transform_indices = @transform_12, window_bounds = array<i64: 8, 1>}, {pipeline_mode = #tpu.pipeline_mode<synchronous>, transform_indices = @transform_13, window_bounds = array<i64: 8, 1>}, {pipeline_mode = #tpu.pipeline_mode<synchronous>, transform_indices = @transform_14, window_bounds = array<i64: 4, 72>}, {pipeline_mode = #tpu.pipeline_mode<synchronous>, transform_indices = @transform_15, window_bounds = array<i64: 4, 1>}, {pipeline_mode = #tpu.pipeline_mode<synchronous>, transform_indices = @transform_16, window_bounds = array<i64: 4, 1>}, {transform_indices = @transform_17, window_bounds = array<i64: 1, 4, 256>}]} {
    %c0 = arith.constant 0 : index
    %c0_0 = arith.constant 0 : index
    %c0_1 = arith.constant 0 : index
    %0 = vector.load %arg1[%c0, %c0_0, %c0_1] : memref<1x4x256xf32, #tpu.memory_space<vmem>>, vector<1x4x256xf32>
    %1 = vector.shape_cast %0 : vector<1x4x256xf32> to vector<4x256xf32>
    %cst = arith.constant 0.000000e+00 : f32
    %2 = vector.broadcast %cst : f32 to vector<4x290xf32>
    %c0_2 = arith.constant 0 : index
    %c0_3 = arith.constant 0 : index
    %3 = vector.load %arg19[%c0_2, %c0_3] : memref<4x290xf32, #tpu.memory_space<vmem>>, vector<4x290xf32>
    tpu.vector_store %arg19[%c0_2, %c0_3], %2 {strides = array<i32>} : memref<4x290xf32, #tpu.memory_space<vmem>>, vector<4x290xf32>,
    %c0_4 = arith.constant 0 : index
    %c17 = arith.constant 17 : index
    %4 = vector.load %arg19[%c0_4, %c17] : memref<4x290xf32, #tpu.memory_space<vmem>>, vector<4x256xf32>
    tpu.vector_store %arg19[%c0_4, %c17], %1 {strides = array<i32>} : memref<4x290xf32, #tpu.memory_space<vmem>>, vector<4x256xf32>,
    %c0_5 = arith.constant 0 : index
    %c0_6 = arith.constant 0 : index
    %5 = vector.load %arg19[%c0_5, %c0_6] : memref<4x290xf32, #tpu.memory_space<vmem>>, vector<4x256xf32>
    %c0_7 = arith.constant 0 : index
    %c0_8 = arith.constant 0 : index
    %6 = vector.load %arg2[%c0_7, %c0_8] : memref<9x256xf32, #tpu.memory_space<vmem>>, vector<1x256xf32>
    %7 = vector.broadcast %6 : vector<1x256xf32> to vector<4x256xf32>
    %8 = arith.mulf %5, %7 : vector<4x256xf32>
    %c0_9 = arith.constant 0 : index
    %c1 = arith.constant 1 : index
    %9 = vector.load %arg19[%c0_9, %c1] : memref<4x290xf32, #tpu.memory_space<vmem>>, vector<4x256xf32>
    %c1_10 = arith.constant 1 : index
    %c0_11 = arith.constant 0 : index
    %10 = vector.load %arg2[%c1_10, %c0_11] : memref<9x256xf32, #tpu.memory_space<vmem>>, vector<1x256xf32>
    %11 = vector.broadcast %10 : vector<1x256xf32> to vector<4x256xf32>
    %12 = arith.mulf %9, %11 : vector<4x256xf32>
    %c0_12 = arith.constant 0 : index
    %c2 = arith.constant 2 : index
    %13 = vector.load %arg19[%c0_12, %c2] : memref<4x290xf32, #tpu.memory_space<vmem>>, vector<4x256xf32>
    %c2_13 = arith.constant 2 : index
    %c0_14 = arith.constant 0 : index
    %14 = vector.load %arg2[%c2_13, %c0_14] : memref<9x256xf32, #tpu.memory_space<vmem>>, vector<1x256xf32>
    %15 = vector.broadcast %14 : vector<1x256xf32> to vector<4x256xf32>
    %16 = arith.mulf %13, %15 : vector<4x256xf32>
    %c0_15 = arith.constant 0 : index
    %c16 = arith.constant 16 : index
    %17 = vector.load %arg19[%c0_15, %c16] : memref<4x290xf32, #tpu.memory_space<vmem>>, vector<4x256xf32>
    %c3 = arith.constant 3 : index
    %c0_16 = arith.constant 0 : index
    %18 = vector.load %arg2[%c3, %c0_16] : memref<9x256xf32, #tpu.memory_space<vmem>>, vector<1x256xf32>
    %19 = vector.broadcast %18 : vector<1x256xf32> to vector<4x256xf32>
    %20 = arith.mulf %17, %19 : vector<4x256xf32>
    %c0_17 = arith.constant 0 : index
    %c17_18 = arith.constant 17 : index
    %21 = vector.load %arg19[%c0_17, %c17_18] : memref<4x290xf32, #tpu.memory_space<vmem>>, vector<4x256xf32>
    %c4 = arith.constant 4 : index
    %c0_19 = arith.constant 0 : index
    %22 = vector.load %arg2[%c4, %c0_19] : memref<9x256xf32, #tpu.memory_space<vmem>>, vector<1x256xf32>
    %23 = vector.broadcast %22 : vector<1x256xf32> to vector<4x256xf32>
    %24 = arith.mulf %21, %23 : vector<4x256xf32>
    %c0_20 = arith.constant 0 : index
    %c18 = arith.constant 18 : index
    %25 = vector.load %arg19[%c0_20, %c18] : memref<4x290xf32, #tpu.memory_space<vmem>>, vector<4x256xf32>
    %c5 = arith.constant 5 : index
    %c0_21 = arith.constant 0 : index
    %26 = vector.load %arg2[%c5, %c0_21] : memref<9x256xf32, #tpu.memory_space<vmem>>, vector<1x256xf32>
    %27 = vector.broadcast %26 : vector<1x256xf32> to vector<4x256xf32>
    %28 = arith.mulf %25, %27 : vector<4x256xf32>
    %c0_22 = arith.constant 0 : index
    %c32 = arith.constant 32 : index
    %29 = vector.load %arg19[%c0_22, %c32] : memref<4x290xf32, #tpu.memory_space<vmem>>, vector<4x256xf32>
    %c6 = arith.constant 6 : index
    %c0_23 = arith.constant 0 : index
    %30 = vector.load %arg2[%c6, %c0_23] : memref<9x256xf32, #tpu.memory_space<vmem>>, vector<1x256xf32>
    %31 = vector.broadcast %30 : vector<1x256xf32> to vector<4x256xf32>
    %32 = arith.mulf %29, %31 : vector<4x256xf32>
    %c0_24 = arith.constant 0 : index
    %c33 = arith.constant 33 : index
    %33 = vector.load %arg19[%c0_24, %c33] : memref<4x290xf32, #tpu.memory_space<vmem>>, vector<4x256xf32>
    %c7 = arith.constant 7 : index
    %c0_25 = arith.constant 0 : index
    %34 = vector.load %arg2[%c7, %c0_25] : memref<9x256xf32, #tpu.memory_space<vmem>>, vector<1x256xf32>
    %35 = vector.broadcast %34 : vector<1x256xf32> to vector<4x256xf32>
    %36 = arith.mulf %33, %35 : vector<4x256xf32>
    %c0_26 = arith.constant 0 : index
    %c34 = arith.constant 34 : index
    %37 = vector.load %arg19[%c0_26, %c34] : memref<4x290xf32, #tpu.memory_space<vmem>>, vector<4x256xf32>
    %c8 = arith.constant 8 : index
    %c0_27 = arith.constant 0 : index
    %38 = vector.load %arg2[%c8, %c0_27] : memref<9x256xf32, #tpu.memory_space<vmem>>, vector<1x256xf32>
    %39 = vector.broadcast %38 : vector<1x256xf32> to vector<4x256xf32>
    %40 = arith.mulf %37, %39 : vector<4x256xf32>
    %41 = tpu.concatenate %8, %12, %16, %20, %24, %28, %32, %36, %40 in 0 : vector<4x256xf32>, vector<4x256xf32>, vector<4x256xf32>, vector<4x256xf32>, vector<4x256xf32>, vector<4x256xf32>, vector<4x256xf32>, vector<4x256xf32>, vector<4x256xf32> -> vector<36x256xf32>
    %c0_28 = arith.constant 0 : index
    %c0_29 = arith.constant 0 : index
    %42 = vector.load %arg4[%c0_28, %c0_29] : memref<8x36xf32, #tpu.memory_space<vmem>>, vector<8x36xf32>
    %cst_30 = arith.constant dense<0.000000e+00> : vector<8x256xf32>
    %43 = tpu.matmul %42, %41, %cst_30 {dimension_numbers = #tpu.dot_dimension_numbers<[1], [0], [0], [1], [0, 0, 1, 1], [], []>} : vector<8x36xf32>, vector<36x256xf32>, vector<8x256xf32> -> vector<8x256xf32>
    %c0_31 = arith.constant 0 : index
    %c0_32 = arith.constant 0 : index
    %44 = vector.load %arg5[%c0_31, %c0_32] : memref<8x1xf32, #tpu.memory_space<vmem>>, vector<8x1xf32>
    %45 = vector.broadcast %44 : vector<8x1xf32> to vector<8x256xf32>
    %46 = arith.mulf %43, %45 : vector<8x256xf32>
    %c0_33 = arith.constant 0 : index
    %c0_34 = arith.constant 0 : index
    %47 = vector.load %arg6[%c0_33, %c0_34] : memref<8x1xf32, #tpu.memory_space<vmem>>, vector<8x1xf32>
    %48 = vector.broadcast %47 : vector<8x1xf32> to vector<8x256xf32>
    %49 = arith.addf %46, %48 : vector<8x256xf32>
    %50 = arith.negf %49 : vector<8x256xf32>
    %51 = math.exp %50 : vector<8x256xf32>
    %cst_35 = arith.constant 1.000000e+00 : f32
    %52 = vector.broadcast %cst_35 : f32 to vector<8x256xf32>
    %53 = arith.addf %52, %51 : vector<8x256xf32>
    %54 = arith.divf %52, %53 : vector<8x256xf32>
    %55 = arith.mulf %49, %54 : vector<8x256xf32>
    %cst_36 = arith.constant 0.000000e+00 : f32
    %56 = vector.broadcast %cst_36 : f32 to vector<8x290xf32>
    %c0_37 = arith.constant 0 : index
    %c0_38 = arith.constant 0 : index
    %57 = vector.load %arg20[%c0_37, %c0_38] : memref<8x290xf32, #tpu.memory_space<vmem>>, vector<8x290xf32>
    tpu.vector_store %arg20[%c0_37, %c0_38], %56 {strides = array<i32>} : memref<8x290xf32, #tpu.memory_space<vmem>>, vector<8x290xf32>,
    %c0_39 = arith.constant 0 : index
    %c17_40 = arith.constant 17 : index
    %58 = vector.load %arg20[%c0_39, %c17_40] : memref<8x290xf32, #tpu.memory_space<vmem>>, vector<8x256xf32>
    tpu.vector_store %arg20[%c0_39, %c17_40], %55 {strides = array<i32>} : memref<8x290xf32, #tpu.memory_space<vmem>>, vector<8x256xf32>,
    %c0_41 = arith.constant 0 : index
    %c0_42 = arith.constant 0 : index
    %59 = vector.load %arg20[%c0_41, %c0_42] : memref<8x290xf32, #tpu.memory_space<vmem>>, vector<8x256xf32>
    %c0_43 = arith.constant 0 : index
    %c0_44 = arith.constant 0 : index
    %60 = vector.load %arg3[%c0_43, %c0_44] : memref<9x256xf32, #tpu.memory_space<vmem>>, vector<1x256xf32>
    %61 = vector.broadcast %60 : vector<1x256xf32> to vector<8x256xf32>
    %62 = arith.mulf %59, %61 : vector<8x256xf32>
    %c0_45 = arith.constant 0 : index
    %c1_46 = arith.constant 1 : index
    %63 = vector.load %arg20[%c0_45, %c1_46] : memref<8x290xf32, #tpu.memory_space<vmem>>, vector<8x256xf32>
    %c1_47 = arith.constant 1 : index
    %c0_48 = arith.constant 0 : index
    %64 = vector.load %arg3[%c1_47, %c0_48] : memref<9x256xf32, #tpu.memory_space<vmem>>, vector<1x256xf32>
    %65 = vector.broadcast %64 : vector<1x256xf32> to vector<8x256xf32>
    %66 = arith.mulf %63, %65 : vector<8x256xf32>
    %c0_49 = arith.constant 0 : index
    %c2_50 = arith.constant 2 : index
    %67 = vector.load %arg20[%c0_49, %c2_50] : memref<8x290xf32, #tpu.memory_space<vmem>>, vector<8x256xf32>
    %c2_51 = arith.constant 2 : index
    %c0_52 = arith.constant 0 : index
    %68 = vector.load %arg3[%c2_51, %c0_52] : memref<9x256xf32, #tpu.memory_space<vmem>>, vector<1x256xf32>
    %69 = vector.broadcast %68 : vector<1x256xf32> to vector<8x256xf32>
    %70 = arith.mulf %67, %69 : vector<8x256xf32>
    %c0_53 = arith.constant 0 : index
    %c16_54 = arith.constant 16 : index
    %71 = vector.load %arg20[%c0_53, %c16_54] : memref<8x290xf32, #tpu.memory_space<vmem>>, vector<8x256xf32>
    %c3_55 = arith.constant 3 : index
    %c0_56 = arith.constant 0 : index
    %72 = vector.load %arg3[%c3_55, %c0_56] : memref<9x256xf32, #tpu.memory_space<vmem>>, vector<1x256xf32>
    %73 = vector.broadcast %72 : vector<1x256xf32> to vector<8x256xf32>
    %74 = arith.mulf %71, %73 : vector<8x256xf32>
    %c0_57 = arith.constant 0 : index
    %c17_58 = arith.constant 17 : index
    %75 = vector.load %arg20[%c0_57, %c17_58] : memref<8x290xf32, #tpu.memory_space<vmem>>, vector<8x256xf32>
    %c4_59 = arith.constant 4 : index
    %c0_60 = arith.constant 0 : index
    %76 = vector.load %arg3[%c4_59, %c0_60] : memref<9x256xf32, #tpu.memory_space<vmem>>, vector<1x256xf32>
    %77 = vector.broadcast %76 : vector<1x256xf32> to vector<8x256xf32>
    %78 = arith.mulf %75, %77 : vector<8x256xf32>
    %c0_61 = arith.constant 0 : index
    %c18_62 = arith.constant 18 : index
    %79 = vector.load %arg20[%c0_61, %c18_62] : memref<8x290xf32, #tpu.memory_space<vmem>>, vector<8x256xf32>
    %c5_63 = arith.constant 5 : index
    %c0_64 = arith.constant 0 : index
    %80 = vector.load %arg3[%c5_63, %c0_64] : memref<9x256xf32, #tpu.memory_space<vmem>>, vector<1x256xf32>
    %81 = vector.broadcast %80 : vector<1x256xf32> to vector<8x256xf32>
    %82 = arith.mulf %79, %81 : vector<8x256xf32>
    %c0_65 = arith.constant 0 : index
    %c32_66 = arith.constant 32 : index
    %83 = vector.load %arg20[%c0_65, %c32_66] : memref<8x290xf32, #tpu.memory_space<vmem>>, vector<8x256xf32>
    %c6_67 = arith.constant 6 : index
    %c0_68 = arith.constant 0 : index
    %84 = vector.load %arg3[%c6_67, %c0_68] : memref<9x256xf32, #tpu.memory_space<vmem>>, vector<1x256xf32>
    %85 = vector.broadcast %84 : vector<1x256xf32> to vector<8x256xf32>
    %86 = arith.mulf %83, %85 : vector<8x256xf32>
    %c0_69 = arith.constant 0 : index
    %c33_70 = arith.constant 33 : index
    %87 = vector.load %arg20[%c0_69, %c33_70] : memref<8x290xf32, #tpu.memory_space<vmem>>, vector<8x256xf32>
    %c7_71 = arith.constant 7 : index
    %c0_72 = arith.constant 0 : index
    %88 = vector.load %arg3[%c7_71, %c0_72] : memref<9x256xf32, #tpu.memory_space<vmem>>, vector<1x256xf32>
    %89 = vector.broadcast %88 : vector<1x256xf32> to vector<8x256xf32>
    %90 = arith.mulf %87, %89 : vector<8x256xf32>
    %c0_73 = arith.constant 0 : index
    %c34_74 = arith.constant 34 : index
    %91 = vector.load %arg20[%c0_73, %c34_74] : memref<8x290xf32, #tpu.memory_space<vmem>>, vector<8x256xf32>
    %c8_75 = arith.constant 8 : index
    %c0_76 = arith.constant 0 : index
    %92 = vector.load %arg3[%c8_75, %c0_76] : memref<9x256xf32, #tpu.memory_space<vmem>>, vector<1x256xf32>
    %93 = vector.broadcast %92 : vector<1x256xf32> to vector<8x256xf32>
    %94 = arith.mulf %91, %93 : vector<8x256xf32>
    %c0_77 = arith.constant 0 : index
    %c0_78 = arith.constant 0 : index
    %95 = vector.load %arg7[%c0_77, %c0_78] : memref<8x9xf32, #tpu.memory_space<vmem>>, vector<8x1xf32>
    %96 = vector.broadcast %95 : vector<8x1xf32> to vector<8x256xf32>
    %97 = arith.mulf %62, %96 : vector<8x256xf32>
    %c0_79 = arith.constant 0 : index
    %c1_80 = arith.constant 1 : index
    %98 = vector.load %arg7[%c0_79, %c1_80] : memref<8x9xf32, #tpu.memory_space<vmem>>, vector<8x1xf32>
    %99 = vector.broadcast %98 : vector<8x1xf32> to vector<8x256xf32>
    %100 = arith.mulf %66, %99 : vector<8x256xf32>
    %101 = arith.addf %97, %100 : vector<8x256xf32>
    %c0_81 = arith.constant 0 : index
    %c2_82 = arith.constant 2 : index
    %102 = vector.load %arg7[%c0_81, %c2_82] : memref<8x9xf32, #tpu.memory_space<vmem>>, vector<8x1xf32>
    %103 = vector.broadcast %102 : vector<8x1xf32> to vector<8x256xf32>
    %104 = arith.mulf %70, %103 : vector<8x256xf32>
    %105 = arith.addf %101, %104 : vector<8x256xf32>
    %c0_83 = arith.constant 0 : index
    %c3_84 = arith.constant 3 : index
    %106 = vector.load %arg7[%c0_83, %c3_84] : memref<8x9xf32, #tpu.memory_space<vmem>>, vector<8x1xf32>
    %107 = vector.broadcast %106 : vector<8x1xf32> to vector<8x256xf32>
    %108 = arith.mulf %74, %107 : vector<8x256xf32>
    %109 = arith.addf %105, %108 : vector<8x256xf32>
    %c0_85 = arith.constant 0 : index
    %c4_86 = arith.constant 4 : index
    %110 = vector.load %arg7[%c0_85, %c4_86] : memref<8x9xf32, #tpu.memory_space<vmem>>, vector<8x1xf32>
    %111 = vector.broadcast %110 : vector<8x1xf32> to vector<8x256xf32>
    %112 = arith.mulf %78, %111 : vector<8x256xf32>
    %113 = arith.addf %109, %112 : vector<8x256xf32>
    %c0_87 = arith.constant 0 : index
    %c5_88 = arith.constant 5 : index
    %114 = vector.load %arg7[%c0_87, %c5_88] : memref<8x9xf32, #tpu.memory_space<vmem>>, vector<8x1xf32>
    %115 = vector.broadcast %114 : vector<8x1xf32> to vector<8x256xf32>
    %116 = arith.mulf %82, %115 : vector<8x256xf32>
    %117 = arith.addf %113, %116 : vector<8x256xf32>
    %c0_89 = arith.constant 0 : index
    %c6_90 = arith.constant 6 : index
    %118 = vector.load %arg7[%c0_89, %c6_90] : memref<8x9xf32, #tpu.memory_space<vmem>>, vector<8x1xf32>
    %119 = vector.broadcast %118 : vector<8x1xf32> to vector<8x256xf32>
    %120 = arith.mulf %86, %119 : vector<8x256xf32>
    %121 = arith.addf %117, %120 : vector<8x256xf32>
    %c0_91 = arith.constant 0 : index
    %c7_92 = arith.constant 7 : index
    %122 = vector.load %arg7[%c0_91, %c7_92] : memref<8x9xf32, #tpu.memory_space<vmem>>, vector<8x1xf32>
    %123 = vector.broadcast %122 : vector<8x1xf32> to vector<8x256xf32>
    %124 = arith.mulf %90, %123 : vector<8x256xf32>
    %125 = arith.addf %121, %124 : vector<8x256xf32>
    %c0_93 = arith.constant 0 : index
    %c8_94 = arith.constant 8 : index
    %126 = vector.load %arg7[%c0_93, %c8_94] : memref<8x9xf32, #tpu.memory_space<vmem>>, vector<8x1xf32>
    %127 = vector.broadcast %126 : vector<8x1xf32> to vector<8x256xf32>
    %128 = arith.mulf %94, %127 : vector<8x256xf32>
    %129 = arith.addf %125, %128 : vector<8x256xf32>
    %c0_95 = arith.constant 0 : index
    %c0_96 = arith.constant 0 : index
    %130 = vector.load %arg8[%c0_95, %c0_96] : memref<8x8xf32, #tpu.memory_space<vmem>>, vector<8x8xf32>
    %cst_97 = arith.constant dense<0.000000e+00> : vector<8x256xf32>
    %131 = tpu.matmul %130, %129, %cst_97 {dimension_numbers = #tpu.dot_dimension_numbers<[1], [0], [0], [1], [0, 0, 1, 1], [], []>} : vector<8x8xf32>, vector<8x256xf32>, vector<8x256xf32> -> vector<8x256xf32>
    %c0_98 = arith.constant 0 : index
    %c0_99 = arith.constant 0 : index
    %132 = vector.load %arg9[%c0_98, %c0_99] : memref<8x1xf32, #tpu.memory_space<vmem>>, vector<8x1xf32>
    %133 = vector.broadcast %132 : vector<8x1xf32> to vector<8x256xf32>
    %134 = arith.mulf %131, %133 : vector<8x256xf32>
    %c0_100 = arith.constant 0 : index
    %c0_101 = arith.constant 0 : index
    %135 = vector.load %arg10[%c0_100, %c0_101] : memref<8x1xf32, #tpu.memory_space<vmem>>, vector<8x1xf32>
    %136 = vector.broadcast %135 : vector<8x1xf32> to vector<8x256xf32>
    %137 = arith.addf %134, %136 : vector<8x256xf32>
    %cst_102 = arith.constant dense<0.000000e+00> : vector<8xf32>
    %138 = vector.multi_reduction <add>, %137, %cst_102 [1] : vector<8x256xf32> to vector<8xf32>
    %139 = vector.shape_cast %138 : vector<8xf32> to vector<8x1xf32>
    %cst_103 = arith.constant 3.906250e-03 : f32
    %140 = vector.broadcast %cst_103 : f32 to vector<8x1xf32>
    %141 = arith.mulf %139, %140 : vector<8x1xf32>
    %c0_104 = arith.constant 0 : index
    %c0_105 = arith.constant 0 : index
    %142 = vector.load %arg11[%c0_104, %c0_105] : memref<8x1xf32, #tpu.memory_space<vmem>>, vector<8x1xf32>
    %143 = arith.mulf %142, %141 : vector<8x1xf32>
    %cst_106 = arith.constant dense<0.000000e+00> : vector<1xf32>
    %144 = vector.multi_reduction <add>, %143, %cst_106 [0] : vector<8x1xf32> to vector<1xf32>
    %145 = vector.shape_cast %144 : vector<1xf32> to vector<1x1xf32>
    %c0_107 = arith.constant 0 : index
    %c0_108 = arith.constant 0 : index
    %146 = vector.load %arg12[%c0_107, %c0_108] : memref<1x1xf32, #tpu.memory_space<vmem>>, vector<1x1xf32>
    %147 = arith.addf %145, %146 : vector<1x1xf32>
    %148 = arith.negf %147 : vector<1x1xf32>
    %149 = math.exp %148 : vector<1x1xf32>
    %cst_109 = arith.constant 1.000000e+00 : f32
    %150 = vector.broadcast %cst_109 : f32 to vector<1x1xf32>
    %151 = arith.addf %150, %149 : vector<1x1xf32>
    %152 = arith.divf %150, %151 : vector<1x1xf32>
    %153 = arith.mulf %147, %152 : vector<1x1xf32>
    %c0_110 = arith.constant 0 : index
    %c0_111 = arith.constant 0 : index
    %154 = vector.load %arg13[%c0_110, %c0_111] : memref<8x1xf32, #tpu.memory_space<vmem>>, vector<8x1xf32>
    %155 = vector.broadcast %153 : vector<1x1xf32> to vector<8x1xf32>
    %156 = arith.mulf %154, %155 : vector<8x1xf32>
    %cst_112 = arith.constant dense<0.000000e+00> : vector<8xf32>
    %157 = vector.multi_reduction <add>, %156, %cst_112 [1] : vector<8x1xf32> to vector<8xf32>
    %158 = vector.shape_cast %157 : vector<8xf32> to vector<8x1xf32>
    %c0_113 = arith.constant 0 : index
    %c0_114 = arith.constant 0 : index
    %159 = vector.load %arg14[%c0_113, %c0_114] : memref<8x1xf32, #tpu.memory_space<vmem>>, vector<8x1xf32>
    %160 = arith.addf %158, %159 : vector<8x1xf32>
    %161 = arith.negf %160 : vector<8x1xf32>
    %162 = math.exp %161 : vector<8x1xf32>
    %cst_115 = arith.constant 1.000000e+00 : f32
    %163 = vector.broadcast %cst_115 : f32 to vector<8x1xf32>
    %164 = arith.addf %163, %162 : vector<8x1xf32>
    %165 = arith.divf %163, %164 : vector<8x1xf32>
    %166 = vector.broadcast %165 : vector<8x1xf32> to vector<8x256xf32>
    %167 = arith.mulf %137, %166 : vector<8x256xf32>
    %cst_116 = arith.constant 0.000000e+00 : f32
    %168 = vector.broadcast %cst_116 : f32 to vector<8x290xf32>
    %c0_117 = arith.constant 0 : index
    %c0_118 = arith.constant 0 : index
    %169 = vector.load %arg21[%c0_117, %c0_118] : memref<8x290xf32, #tpu.memory_space<vmem>>, vector<8x290xf32>
    tpu.vector_store %arg21[%c0_117, %c0_118], %168 {strides = array<i32>} : memref<8x290xf32, #tpu.memory_space<vmem>>, vector<8x290xf32>,
    %c0_119 = arith.constant 0 : index
    %c17_120 = arith.constant 17 : index
    %170 = vector.load %arg21[%c0_119, %c17_120] : memref<8x290xf32, #tpu.memory_space<vmem>>, vector<8x256xf32>
    tpu.vector_store %arg21[%c0_119, %c17_120], %167 {strides = array<i32>} : memref<8x290xf32, #tpu.memory_space<vmem>>, vector<8x256xf32>,
    %c0_121 = arith.constant 0 : index
    %c0_122 = arith.constant 0 : index
    %171 = vector.load %arg21[%c0_121, %c0_122] : memref<8x290xf32, #tpu.memory_space<vmem>>, vector<8x256xf32>
    %c0_123 = arith.constant 0 : index
    %c0_124 = arith.constant 0 : index
    %172 = vector.load %arg2[%c0_123, %c0_124] : memref<9x256xf32, #tpu.memory_space<vmem>>, vector<1x256xf32>
    %173 = vector.broadcast %172 : vector<1x256xf32> to vector<8x256xf32>
    %174 = arith.mulf %171, %173 : vector<8x256xf32>
    %c0_125 = arith.constant 0 : index
    %c1_126 = arith.constant 1 : index
    %175 = vector.load %arg21[%c0_125, %c1_126] : memref<8x290xf32, #tpu.memory_space<vmem>>, vector<8x256xf32>
    %c1_127 = arith.constant 1 : index
    %c0_128 = arith.constant 0 : index
    %176 = vector.load %arg2[%c1_127, %c0_128] : memref<9x256xf32, #tpu.memory_space<vmem>>, vector<1x256xf32>
    %177 = vector.broadcast %176 : vector<1x256xf32> to vector<8x256xf32>
    %178 = arith.mulf %175, %177 : vector<8x256xf32>
    %c0_129 = arith.constant 0 : index
    %c2_130 = arith.constant 2 : index
    %179 = vector.load %arg21[%c0_129, %c2_130] : memref<8x290xf32, #tpu.memory_space<vmem>>, vector<8x256xf32>
    %c2_131 = arith.constant 2 : index
    %c0_132 = arith.constant 0 : index
    %180 = vector.load %arg2[%c2_131, %c0_132] : memref<9x256xf32, #tpu.memory_space<vmem>>, vector<1x256xf32>
    %181 = vector.broadcast %180 : vector<1x256xf32> to vector<8x256xf32>
    %182 = arith.mulf %179, %181 : vector<8x256xf32>
    %c0_133 = arith.constant 0 : index
    %c16_134 = arith.constant 16 : index
    %183 = vector.load %arg21[%c0_133, %c16_134] : memref<8x290xf32, #tpu.memory_space<vmem>>, vector<8x256xf32>
    %c3_135 = arith.constant 3 : index
    %c0_136 = arith.constant 0 : index
    %184 = vector.load %arg2[%c3_135, %c0_136] : memref<9x256xf32, #tpu.memory_space<vmem>>, vector<1x256xf32>
    %185 = vector.broadcast %184 : vector<1x256xf32> to vector<8x256xf32>
    %186 = arith.mulf %183, %185 : vector<8x256xf32>
    %c0_137 = arith.constant 0 : index
    %c17_138 = arith.constant 17 : index
    %187 = vector.load %arg21[%c0_137, %c17_138] : memref<8x290xf32, #tpu.memory_space<vmem>>, vector<8x256xf32>
    %c4_139 = arith.constant 4 : index
    %c0_140 = arith.constant 0 : index
    %188 = vector.load %arg2[%c4_139, %c0_140] : memref<9x256xf32, #tpu.memory_space<vmem>>, vector<1x256xf32>
    %189 = vector.broadcast %188 : vector<1x256xf32> to vector<8x256xf32>
    %190 = arith.mulf %187, %189 : vector<8x256xf32>
    %c0_141 = arith.constant 0 : index
    %c18_142 = arith.constant 18 : index
    %191 = vector.load %arg21[%c0_141, %c18_142] : memref<8x290xf32, #tpu.memory_space<vmem>>, vector<8x256xf32>
    %c5_143 = arith.constant 5 : index
    %c0_144 = arith.constant 0 : index
    %192 = vector.load %arg2[%c5_143, %c0_144] : memref<9x256xf32, #tpu.memory_space<vmem>>, vector<1x256xf32>
    %193 = vector.broadcast %192 : vector<1x256xf32> to vector<8x256xf32>
    %194 = arith.mulf %191, %193 : vector<8x256xf32>
    %c0_145 = arith.constant 0 : index
    %c32_146 = arith.constant 32 : index
    %195 = vector.load %arg21[%c0_145, %c32_146] : memref<8x290xf32, #tpu.memory_space<vmem>>, vector<8x256xf32>
    %c6_147 = arith.constant 6 : index
    %c0_148 = arith.constant 0 : index
    %196 = vector.load %arg2[%c6_147, %c0_148] : memref<9x256xf32, #tpu.memory_space<vmem>>, vector<1x256xf32>
    %197 = vector.broadcast %196 : vector<1x256xf32> to vector<8x256xf32>
    %198 = arith.mulf %195, %197 : vector<8x256xf32>
    %c0_149 = arith.constant 0 : index
    %c33_150 = arith.constant 33 : index
    %199 = vector.load %arg21[%c0_149, %c33_150] : memref<8x290xf32, #tpu.memory_space<vmem>>, vector<8x256xf32>
    %c7_151 = arith.constant 7 : index
    %c0_152 = arith.constant 0 : index
    %200 = vector.load %arg2[%c7_151, %c0_152] : memref<9x256xf32, #tpu.memory_space<vmem>>, vector<1x256xf32>
    %201 = vector.broadcast %200 : vector<1x256xf32> to vector<8x256xf32>
    %202 = arith.mulf %199, %201 : vector<8x256xf32>
    %c0_153 = arith.constant 0 : index
    %c34_154 = arith.constant 34 : index
    %203 = vector.load %arg21[%c0_153, %c34_154] : memref<8x290xf32, #tpu.memory_space<vmem>>, vector<8x256xf32>
    %c8_155 = arith.constant 8 : index
    %c0_156 = arith.constant 0 : index
    %204 = vector.load %arg2[%c8_155, %c0_156] : memref<9x256xf32, #tpu.memory_space<vmem>>, vector<1x256xf32>
    %205 = vector.broadcast %204 : vector<1x256xf32> to vector<8x256xf32>
    %206 = arith.mulf %203, %205 : vector<8x256xf32>
    %207 = tpu.concatenate %174, %178, %182, %186, %190, %194, %198, %202, %206 in 0 : vector<8x256xf32>, vector<8x256xf32>, vector<8x256xf32>, vector<8x256xf32>, vector<8x256xf32>, vector<8x256xf32>, vector<8x256xf32>, vector<8x256xf32>, vector<8x256xf32> -> vector<72x256xf32>
    %c0_157 = arith.constant 0 : index
    %c0_158 = arith.constant 0 : index
    %208 = vector.load %arg15[%c0_157, %c0_158] : memref<4x72xf32, #tpu.memory_space<vmem>>, vector<4x72xf32>
    %cst_159 = arith.constant dense<0.000000e+00> : vector<4x256xf32>
    %209 = tpu.matmul %208, %207, %cst_159 {dimension_numbers = #tpu.dot_dimension_numbers<[1], [0], [0], [1], [0, 0, 1, 1], [], []>} : vector<4x72xf32>, vector<72x256xf32>, vector<4x256xf32> -> vector<4x256xf32>
    %c0_160 = arith.constant 0 : index
    %c0_161 = arith.constant 0 : index
    %210 = vector.load %arg16[%c0_160, %c0_161] : memref<4x1xf32, #tpu.memory_space<vmem>>, vector<4x1xf32>
    %211 = vector.broadcast %210 : vector<4x1xf32> to vector<4x256xf32>
    %212 = arith.mulf %209, %211 : vector<4x256xf32>
    %c0_162 = arith.constant 0 : index
    %c0_163 = arith.constant 0 : index
    %213 = vector.load %arg17[%c0_162, %c0_163] : memref<4x1xf32, #tpu.memory_space<vmem>>, vector<4x1xf32>
    %214 = vector.broadcast %213 : vector<4x1xf32> to vector<4x256xf32>
    %215 = arith.addf %212, %214 : vector<4x256xf32>
    %216 = arith.addf %215, %1 : vector<4x256xf32>
    %c0_164 = arith.constant 0 : index
    %c0_165 = arith.constant 0 : index
    %c0_166 = arith.constant 0 : index
    %217 = vector.load %arg18[%c0_164, %c0_165, %c0_166] : memref<1x4x256xf32, #tpu.memory_space<vmem>>, vector<1x4x256xf32>
    %218 = vector.shape_cast %217 : vector<1x4x256xf32> to vector<4x256xf32>
    %219 = vector.shape_cast %216 : vector<4x256xf32> to vector<1x4x256xf32>
    tpu.vector_store %arg18[%c0_164, %c0_165, %c0_166], %219 {strides = array<i32>} : memref<1x4x256xf32, #tpu.memory_space<vmem>>, vector<1x4x256xf32>,
    return
  }
  func.func @transform_0(%arg0: i32) -> (i32, i32, i32) {
    %c0_i32 = arith.constant 0 : i32
    %c0_i32_0 = arith.constant 0 : i32
    %c0_i32_1 = arith.constant 0 : i32
    return %arg0, %c0_i32, %c0_i32_0 : i32, i32, i32
  }
  func.func @transform_1(%arg0: i32) -> (i32, i32) {
    %c0_i32 = arith.constant 0 : i32
    %c0_i32_0 = arith.constant 0 : i32
    %c0_i32_1 = arith.constant 0 : i32
    return %c0_i32, %c0_i32_0 : i32, i32
  }
  func.func @transform_2(%arg0: i32) -> (i32, i32) {
    %c0_i32 = arith.constant 0 : i32
    %c0_i32_0 = arith.constant 0 : i32
    %c0_i32_1 = arith.constant 0 : i32
    return %c0_i32, %c0_i32_0 : i32, i32
  }
  func.func @transform_3(%arg0: i32) -> (i32, i32) {
    %c0_i32 = arith.constant 0 : i32
    %c0_i32_0 = arith.constant 0 : i32
    %c0_i32_1 = arith.constant 0 : i32
    return %c0_i32, %c0_i32_0 : i32, i32
  }
  func.func @transform_4(%arg0: i32) -> (i32, i32) {
    %c0_i32 = arith.constant 0 : i32
    %c0_i32_0 = arith.constant 0 : i32
    %c0_i32_1 = arith.constant 0 : i32
    return %c0_i32, %c0_i32_0 : i32, i32
  }
  func.func @transform_5(%arg0: i32) -> (i32, i32) {
    %c0_i32 = arith.constant 0 : i32
    %c0_i32_0 = arith.constant 0 : i32
    %c0_i32_1 = arith.constant 0 : i32
    return %c0_i32, %c0_i32_0 : i32, i32
  }
  func.func @transform_6(%arg0: i32) -> (i32, i32) {
    %c0_i32 = arith.constant 0 : i32
    %c0_i32_0 = arith.constant 0 : i32
    %c0_i32_1 = arith.constant 0 : i32
    return %c0_i32, %c0_i32_0 : i32, i32
  }
  func.func @transform_7(%arg0: i32) -> (i32, i32) {
    %c0_i32 = arith.constant 0 : i32
    %c0_i32_0 = arith.constant 0 : i32
    %c0_i32_1 = arith.constant 0 : i32
    return %c0_i32, %c0_i32_0 : i32, i32
  }
  func.func @transform_8(%arg0: i32) -> (i32, i32) {
    %c0_i32 = arith.constant 0 : i32
    %c0_i32_0 = arith.constant 0 : i32
    %c0_i32_1 = arith.constant 0 : i32
    return %c0_i32, %c0_i32_0 : i32, i32
  }
  func.func @transform_9(%arg0: i32) -> (i32, i32) {
    %c0_i32 = arith.constant 0 : i32
    %c0_i32_0 = arith.constant 0 : i32
    %c0_i32_1 = arith.constant 0 : i32
    return %c0_i32, %c0_i32_0 : i32, i32
  }
  func.func @transform_10(%arg0: i32) -> (i32, i32) {
    %c0_i32 = arith.constant 0 : i32
    %c0_i32_0 = arith.constant 0 : i32
    %c0_i32_1 = arith.constant 0 : i32
    return %c0_i32, %c0_i32_0 : i32, i32
  }
  func.func @transform_11(%arg0: i32) -> (i32, i32) {
    %c0_i32 = arith.constant 0 : i32
    %c0_i32_0 = arith.constant 0 : i32
    %c0_i32_1 = arith.constant 0 : i32
    return %c0_i32, %c0_i32_0 : i32, i32
  }
  func.func @transform_12(%arg0: i32) -> (i32, i32) {
    %c0_i32 = arith.constant 0 : i32
    %c0_i32_0 = arith.constant 0 : i32
    %c0_i32_1 = arith.constant 0 : i32
    return %c0_i32, %c0_i32_0 : i32, i32
  }
  func.func @transform_13(%arg0: i32) -> (i32, i32) {
    %c0_i32 = arith.constant 0 : i32
    %c0_i32_0 = arith.constant 0 : i32
    %c0_i32_1 = arith.constant 0 : i32
    return %c0_i32, %c0_i32_0 : i32, i32
  }
  func.func @transform_14(%arg0: i32) -> (i32, i32) {
    %c0_i32 = arith.constant 0 : i32
    %c0_i32_0 = arith.constant 0 : i32
    %c0_i32_1 = arith.constant 0 : i32
    return %c0_i32, %c0_i32_0 : i32, i32
  }
  func.func @transform_15(%arg0: i32) -> (i32, i32) {
    %c0_i32 = arith.constant 0 : i32
    %c0_i32_0 = arith.constant 0 : i32
    %c0_i32_1 = arith.constant 0 : i32
    return %c0_i32, %c0_i32_0 : i32, i32
  }
  func.func @transform_16(%arg0: i32) -> (i32, i32) {
    %c0_i32 = arith.constant 0 : i32
    %c0_i32_0 = arith.constant 0 : i32
    %c0_i32_1 = arith.constant 0 : i32
    return %c0_i32, %c0_i32_0 : i32, i32
  }
  func.func @transform_17(%arg0: i32) -> (i32, i32, i32) {
    %c0_i32 = arith.constant 0 : i32
    %c0_i32_0 = arith.constant 0 : i32
    %c0_i32_1 = arith.constant 0 : i32
    return %arg0, %c0_i32, %c0_i32_0 : i32, i32, i32
  }
}

</mosaic_0001>

<bundles_post_ra>
// kernel: mbconv_forward.1
= control target key start
LH: loop header
LB: loop body
LE: loop exit
PB: predicated region body
PF: predicated region fallthrough
CT: control target
= control target key end

     0   :  { %s2214_s26 = smov 0   ;;  %s2804_s0 = inlined_call_operand.vmem [shape: f32[2,4,256], index: 0, kind: input, shape index: {}]   ;;  %s2805_s1 = inlined_call_operand.vmem [shape: f32[9,256], index: 1, kind: input, shape index: {}, may-alias: {1,2}]   ;;  %s2806_s2 = inlined_call_operand.vmem [shape: f32[9,256], index: 2, kind: input, shape index: {}, may-alias: {1,2}]   ;;  %s2807_s3 = inlined_call_operand.vmem [shape: f32[8,36], index: 3, kind: input, shape index: {}]   ;;  %s2808_s4 = inlined_call_operand.vmem [shape: f32[8,1], index: 4, kind: input, shape index: {}]   ;;  %s2809_s5 = inlined_call_operand.vmem [shape: f32[8,1], index: 5, kind: input, shape index: {}]   ;;  %s2810_s6 = inlined_call_operand.vmem [shape: f32[8,9], index: 6, kind: input, shape index: {}]   ;;  %s2811_s7 = inlined_call_operand.vmem [shape: f32[8,8], index: 7, kind: input, shape index: {}]   ;;  %s2812_s8 = inlined_call_operand.vmem [shape: f32[8,1], index: 8, kind: input, shape index: {}]   ;;  %s2813_s9 = inlined_call_operand.vmem [shape: f32[8,1], index: 9, kind: input, shape index: {}]   ;;  %s2814_s10 = inlined_call_operand.vmem [shape: f32[8,1], index: 10, kind: input, shape index: {}]   ;;  %s2815_s11 = inlined_call_operand.<no memory space> [shape: f32[1,1], index: 11, kind: input, shape index: {}]   ;;  %s2816_s12 = inlined_call_operand.vmem [shape: f32[8,1], index: 12, kind: input, shape index: {}]   ;;  %s2817_s13 = inlined_call_operand.vmem [shape: f32[8,1], index: 13, kind: input, shape index: {}]   ;;  %s2818_s14 = inlined_call_operand.vmem [shape: f32[4,72], index: 14, kind: input, shape index: {}]   ;;  %s2819_s15 = inlined_call_operand.vmem [shape: f32[4,1], index: 15, kind: input, shape index: {}]   ;;  %s2820_s16 = inlined_call_operand.vmem [shape: f32[4,1], index: 16, kind: input, shape index: {}]   ;;  %s2821_s17 = inlined_call_operand.vmem [shape: f32[2,4,256], index: 17, kind: output, shape index: {}]  }
   0x1   :  { %2861 = sst [smem:[#allocation6_spill]] %s2804_s0  ;;  %v22_v0 = vstv %s2815_s11 }
   0x2   :  { %2862 = sst [smem:[#allocation7_spill]] %s2805_s1  ;;  %23 = vst [vmem:[#allocation5] sm:$0x1] %v22_v0 }
   0x3   :  { %2863 = sst [smem:[#allocation8_spill]] %s2806_s2 }
   0x4   :  { %2864 = sst [smem:[#allocation9_spill]] %s2807_s3 }
   0x5   :  { %2865 = sst [smem:[#allocation10_spill]] %s2808_s4 }
   0x6   :  { %2866 = sst [smem:[#allocation11_spill]] %s2809_s5 }
   0x7   :  { %2867 = sst [smem:[#allocation12_spill]] %s2810_s6 }
   0x8   :  { %2868 = sst [smem:[#allocation13_spill]] %s2811_s7 }
   0x9   :  { %2869 = sst [smem:[#allocation14_spill]] %s2812_s8 }
   0xa LB: > { %s1978_s27 = sadd.s32 4294967295, %s2093_s26   ;;  %p1982_p0 = scmp.ge.s32.totalorder %s2093_s26, 1  ;;  %s2093_s26 = sphi %s2214_s26, %s29_s26  }
   0xb   : > { %p489_p1 = scmp.lt.s32.totalorder %s2093_s26, 3 }
   0xd   : > { %p490_p2 = pnand %p1982_p0, %p489_p1 }
   0xe   : > { %p541_p3 = scmp.lt.s32.totalorder (!%p490_p2), %s1978_s27, 1  ;;  %s2870_s29 = sld [smem:[#allocation7_spill]] (!%p490_p2) }
   0xf   : > { %493 = sbr.rel (%p490_p2) target bundleno = 1893 (0x765), region = 88  ;;  %s2871_s24 = sld [smem:[#allocation6_spill]] (!%p490_p2) }
  0x10   : > { %s2842_s11 = smov (!%p490_p2), 17   ;;  %s2828_s19 = smov (!%p490_p2), 32  }
  0x11   : > { %s2824_s20 = smov (!%p490_p2), 34   ;;  %s2826_s28 = smov (!%p490_p2), 33  }
  0x12   : > { %s2830_s0 = smov (!%p490_p2), 18   ;;  %s2854_s30 = smov (!%p490_p2), 2  }
  0x13   : > { %s2850_s18 = smov (!%p490_p2), 16   ;;  %s2852_s21 = smov (!%p490_p2), 1  }
  0x14   : > { %v572_v1 = vlaneseq  ;;  %v2095_v2 = vmov 0.0   ;;  %vm553_vm0 = vcmask 273408   ;;  %s2911_s27 = smov (!%p541_p3, %s1978_s27), 1  ;;  %v1992_v4 = vld [vmem:[%s2870_s29 + $0x6] ss:$8 sm:$0x3] }
  0x15   : > { %552 = vst [vmem:[#allocation2] sm:$0xff] %v2095_v2  ;;  %987 = vst [vmem:[#allocation3] sm:$0xff] %v2095_v2  ;;  %950 = vmatprep.mubr.f32.mxu0 %v2095_v2  ;;  %1891 = vmatprep.mubr.f32.mxu1 %v2095_v2  ;;  %v1994_v5 = vld [vmem:[%s2870_s29 + $0x10] ss:$8 sm:$0x3]  ;;  %s2823_s1 = sshll.u32 %s2911_s27, 3 }
  0x16   : > { %1517 = vst [vmem:[#allocation4] sm:$0xff] %v2095_v2  ;;  %v573_v3 = vshrl.u32 %v572_v1, 7  ;;  %554 = vst.msk [vmem:[#allocation2 + $0x8] sm:$0xf] %vm553_vm0, %v2095_v2  ;;  %s2252_s25 = scalar_lea.vmem %s2871_s24, %s2823_s1  ;;  %vm745_vm1 = vcmask 277504   ;;  %vm563_vm2 = vcmask 1043592  }
  0x17   : > { %v1993_v6 = vld [vmem:[%s2870_s29 + $0x7] ss:$8 sm:$0x3]  ;;  %v1990_v9 = vld [vmem:[%s2870_s29 + $0x4] ss:$8 sm:$0x3] }
  0x18   : > { %v2240_v7 = vsub.s32 0, %v573_v3  ;;  %v2242_v8 = vsub.s32 1, %v573_v3  ;;  %v551_v10 = vld [vmem:[%s2252_s25] sm:$0xff]  ;;  %989 = vst.msk [vmem:[#allocation3 + $0x10] sm:$0xff] %vm745_vm1, %v2095_v2  ;;  %1519 = vst.msk [vmem:[#allocation4 + $0x10] sm:$0xff] %vm745_vm1, %v2095_v2  ;;  %vm564_vm3 = vcmask 1047556  }
  0x19   : > { %556 = vrot.lane.b32.xlu0 %v551_v10, %s2842_s11  ;;  %v1991_v18 = vld [vmem:[%s2870_s29 + $0x5] ss:$8 sm:$0x3]  ;;  %v1988_v22 = vld [vmem:[%s2870_s29 + $0x2] ss:$8 sm:$0x3]  ;;  %vm565_vm6 = vmor %vm564_vm3, %vm563_vm2 }
  0x1a   : > { %v694_v11 = vrot.slane %v1992_v4, %v2240_v7  ;;  %v698_v12 = vrot.slane %v1992_v4, %v2242_v8  ;;  %v736_v13 = vrot.slane %v1994_v5, %v2240_v7  ;;  %v740_v14 = vrot.slane %v1994_v5, %v2242_v8  ;;  %v1989_v29 = vld [vmem:[%s2870_s29 + $0x3] ss:$8 sm:$0x3]  ;;  %v1987_v30 = vld [vmem:[%s2870_s29 + $0x1] ss:$8 sm:$0x3] }
  0x1b   : > { %v715_v15 = vrot.slane %v1993_v6, %v2240_v7  ;;  %v719_v16 = vrot.slane %v1993_v6, %v2242_v8  ;;  %v653_v17 = vrot.slane %v1990_v9, %v2240_v7  ;;  %v657_v21 = vrot.slane %v1990_v9, %v2242_v8  ;;  %s2832_s22 = smov 94   ;;  %s2840_s23 = smov 111  }
  0x1c   : > { %v699_v19 = vcombine.low %v694_v11, %v698_v12  ;;  %v741_v20 = vcombine.low %v736_v13, %v740_v14  ;;  %v673_v24 = vrot.slane %v1991_v18, %v2240_v7  ;;  %v677_v25 = vrot.slane %v1991_v18, %v2242_v8  ;;  %s2836_s24 = smov 96   ;;  %s2846_s1 = smov 126  }
  0x1d   : > { %v720_v23 = vcombine.low %v715_v15, %v719_v16  ;;  %v658_v26 = vcombine.low %v653_v17, %v657_v21  ;;  %v611_v27 = vrot.slane %v1988_v22, %v2240_v7  ;;  %v615_v28 = vrot.slane %v1988_v22, %v2242_v8  ;;  %s2872_s4 = sld [smem:[#allocation10_spill]] }
  0x1e   : > { %700 = vrot.lane.b32.xlu1 %v699_v19, %s2828_s19  ;;  %742 = vrot.lane.b32.xlu0 %v741_v20, %s2824_s20  ;;  %v678_v31 = vcombine.low %v673_v24, %v677_v25  ;;  %v632_v32 = vrot.slane %v1989_v29, %v2240_v7  ;;  %v636_v33 = vrot.slane %v1989_v29, %v2242_v8  ;;  %vm559_vm4 = vcmask 138240   ;;  %s2834_s20 = smov 95   ;;  %s2844_s19 = smov 112  }
  0x1f   : > { %v616_v34 = vcombine.low %v611_v27, %v615_v28  ;;  %v590_v35 = vrot.slane %v1987_v30, %v2240_v7  ;;  %v594_v36 = vrot.slane %v1987_v30, %v2242_v8  ;;  %vm567_vm5 = vcmask 134144   ;;  %s2873_s5 = sld [smem:[#allocation11_spill]] }
  0x20   : > { %v637_v37 = vcombine.low %v632_v32, %v636_v33  ;;  %vm703_vm7 = vcmask 261120   ;;  %vm724_vm8 = vcmask 269312   ;;  %vm682_vm9 = vcmask 146432   ;;  %s2874_s2 = sld [smem:[#allocation8_spill]] }
  0x21   : > { %v595_v38 = vcombine.low %v590_v35, %v594_v36  ;;  %vm641_vm10 = vcmask 130048   ;;  %vm620_vm11 = vcmask 15360   ;;  %vm599_vm12 = vcmask 7168   ;;  %s2875_s6 = sld [smem:[#allocation12_spill]] }
  0x22   : > { %721 = vrot.lane.b32.xlu1 %v720_v23, %s2826_s28  ;;  %659 = vrot.lane.b32.xlu0 %v658_v26, %s2842_s11  ;;  %s2838_s28 = smov 110   ;;  %v2112_v30 = vmov 0   ;;  %vm2848_vm13 = vcmask 769024   ;;  %vm868_vm14 = vcmask 1043456   ;;  %vm836_vm15 = vcmask 785408   ;;  %s2876_s3 = sld [smem:[#allocation9_spill]] }
  0x23   : > { %2058 = vset.pattern.permute.xlu1 %v2112_v30  ;;  %2059 = vset.pattern.permute.xlu0 %v2112_v30  ;;  %v957_v36 = vld [vmem:[%s2872_s4] sm:$0xff]  ;;  %vm2849_vm0 = vcmask 777216   ;;  %vm822_vm2 = vcmask 900096   ;;  %vm807_vm3 = vcmask 908288   ;;  %s2882_s11 = smov 126   ;;  %s2889_s8 = sld [smem:[#allocation14_spill]] }
  0x24   : > { %s2894_s7 = sld [smem:[#allocation13_spill]]  ;;  %s2895_s4 = smov 2  }
  0x26   : > { %679 = vrot.lane.b32.xlu1 %v678_v31, %s2830_s0  ;;  %617 = vrot.lane.b32.xlu0 %v616_v34, %s2854_s30  ;;  %s2856_s0 = smov 127  }
  0x2a   : > { %638 = vrot.lane.b32.xlu1 %v637_v37, %s2850_s18  ;;  %596 = vrot.lane.b32.xlu0 %v595_v38, %s2852_s21  ;;  %v965_v37 = vld [vmem:[%s2873_s5] sm:$0xff] }
  0x2b   : > { %v2000_v38 = vld [vmem:[%s2874_s2 + $0x1] ss:$8 sm:$0x3] }
  0x8b   : > { %v557_v39 = vpop.permute.xlu0 %556 }
  0x8c   : > { %v558_v40 = vrot.slane %v557_v39, 4 }
  0x8e   : > { %v560_v41 = vsel %vm559_vm4, %v558_v40, %v557_v39  ;;  %568 = vst.msk [vmem:[#allocation2 + $0x8] sm:$0xf] %vm567_vm5, %v558_v40  ;;  %v1027_v39 = vrot.slane %v2000_v38, %v2240_v7  ;;  %v2368_v40 = vld [vmem:[%s2875_s6] sm:$0xff]  ;;  %vm2860_vm5 = vcmask 916480   ;;  %s2897_s6 = smov 16  }
  0x8f   : > { %566 = vst.msk [vmem:[#allocation2] sm:$0xff] %vm565_vm6, %v560_v41  ;;  %v1031_v41 = vrot.slane %v2000_v38, %v2242_v8  ;;  %vm2859_vm6 = vcmask 1031168   ;;  %v2001_v38 = vld [vmem:[%s2874_s2 + $0x2] ss:$8 sm:$0x3] }
  0x90   : > { %v701_v42 = vpop.permute.xlu1 %700  ;;  %v743_v43 = vpop.permute.xlu0 %742 }
  0x91   : > { %v744_v46 = vrot.slane %v743_v43, 4  ;;  %v702_v49 = vrot.slane %v701_v42, 4 }
  0x93   : > { %v704_v58 = vsel %vm703_vm7, %v702_v49, %v701_v42  ;;  %v746_v3 = vsel %vm745_vm1, %v744_v46, %v743_v43  ;;  %v2113_v42 = vmov 1  }
  0x94   : > { %v2297_v44 = vpop.permute.xlu1 %721  ;;  %v660_v45 = vpop.permute.xlu0 %659 }
  0x95   : > { %v661_v47 = vrot.slane %v660_v45, 4  ;;  %v2299_v48 = vld [vmem:[#allocation2 + $0x8] sm:$0xf]  ;;  %v723_v52 = vrot.slane %v2297_v44, 4 }
  0x96   : > { %v750_v50 = vmul.f32 %v744_v46, %v2299_v48  ;;  %v708_v56 = vmul.f32 %v702_v49, %v2299_v48  ;;  %v2311_v61 = vld [vmem:[#allocation2] sm:$0xff] }
  0x97   : > { %v666_v51 = vmul.f32 %v661_v47, %v2299_v48  ;;  %v725_v59 = vsel %vm724_vm8, %v723_v52, %v2297_v44  ;;  %v707_v62 = vmul.f32 %v704_v58, %v2311_v61  ;;  %v749_v6 = vmul.f32 %v746_v3, %v2311_v61 }
  0x98   : > { %v618_v53 = vpop.permute.xlu0 %617  ;;  %v680_v54 = vpop.permute.xlu1 %679  ;;  %863 = vrot.lane.b32.xlu0 %v750_v50, %s2832_s22  ;;  %v728_v63 = vmul.f32 %v725_v59, %v2311_v61  ;;  %v662_v10 = vsel %vm559_vm4, %v661_v47, %v660_v45  ;;  %v729_v25 = vmul.f32 %v723_v52, %v2299_v48 }
  0x99   : > { %v619_v55 = vrot.slane %v618_v53, 4  ;;  %805 = vrot.lane.b32.xlu1 %v666_v51, %s2840_s23  ;;  %v681_v60 = vrot.slane %v680_v54, 4  ;;  %v665_v11 = vmul.f32 %v662_v10, %v2311_v61  ;;  %v858_v20 = vcombine.high %v749_v6, %v749_v6 }
  0x9a   : > { %v829_v23 = vcombine.high %v707_v62, %v707_v62  ;;  %v843_v26 = vcombine.low %v728_v63, %v728_v63  ;;  %v844_v27 = vcombine.low %v729_v25, %v729_v25 }
  0x9b   : > { %v625_v57 = vmul.f32 %v619_v55, %v2299_v48  ;;  %v683_v0 = vsel %vm682_vm9, %v681_v60, %v680_v54  ;;  %v687_v9 = vmul.f32 %v681_v60, %v2299_v48  ;;  %v621_v18 = vsel %vm620_vm11, %v619_v55, %v618_v53 }
  0x9c   : > { %834 = vrot.lane.b32.xlu0 %v708_v56, %s2836_s24  ;;  %v639_v1 = vpop.permute.xlu1 %638  ;;  %v686_v5 = vmul.f32 %v683_v0, %v2311_v61  ;;  %v597_v15 = vpop.permute.xlu0 %596  ;;  %v624_v21 = vmul.f32 %v621_v18, %v2311_v61  ;;  %v800_v29 = vcombine.high %v665_v11, %v665_v11 }
  0x9d   : > { %776 = vrot.lane.b32.xlu1 %v625_v57, %s2846_s1  ;;  %v640_v4 = vrot.slane %v639_v1, 4  ;;  %v815_v12 = vcombine.low %v687_v9, %v687_v9  ;;  %v598_v19 = vrot.slane %v597_v15, 4 }
  0x9e   : > { %v814_v28 = vcombine.low %v686_v5, %v686_v5  ;;  %v771_v32 = vcombine.high %v624_v21, %v624_v21 }
  0x9f   : > { %v646_v13 = vmul.f32 %v640_v4, %v2299_v48  ;;  %v642_v14 = vsel %vm641_vm10, %v640_v4, %v639_v1  ;;  %v600_v22 = vsel %vm599_vm12, %v598_v19, %v597_v15  ;;  %v604_v33 = vmul.f32 %v598_v19, %v2299_v48 }
  0xa0   : > { %830 = vrot.lane.b32.xlu0 %v707_v62, %s2836_s24  ;;  %v645_v16 = vmul.f32 %v642_v14, %v2311_v61  ;;  %v603_v24 = vmul.f32 %v600_v22, %v2311_v61  ;;  %v570_v62 = vld [vmem:[%s2870_s29] ss:$8 sm:$0x3] }
  0xa1   : > { %847 = vrot.lane.b32.xlu1 %v728_v63, %s2834_s20  ;;  %v786_v17 = vcombine.low %v646_v13, %v646_v13  ;;  %v757_v34 = vcombine.low %v604_v33, %v604_v33  ;;  %v575_v1 = vrot.slane %v570_v62, %v2240_v7  ;;  %v579_v3 = vrot.slane %v570_v62, %v2242_v8 }
  0xa2   : > { %v785_v31 = vcombine.low %v645_v16, %v645_v16  ;;  %v756_v35 = vcombine.low %v603_v24, %v603_v24 }
  0xa3   : > { %v580_v14 = vcombine.low %v575_v1, %v579_v3 }
  0xa4   : > { %818 = vrot.lane.b32.xlu0 %v686_v5, %s2838_s28 }
  0xa5   : > { %859 = vrot.lane.b32.xlu1 %v749_v6, %s2832_s22 }
  0xa8   : > { %801 = vrot.lane.b32.xlu0 %v665_v11, %s2840_s23 }
  0xa9   : > { %820 = vrot.lane.b32.xlu1 %v815_v12, %s2838_s28 }
  0xac   : > { %789 = vrot.lane.b32.xlu0 %v645_v16, %s2844_s19 }
  0xad   : > { %791 = vrot.lane.b32.xlu1 %v786_v17, %s2844_s19 }
  0xb0   : > { %772 = vrot.lane.b32.xlu0 %v624_v21, %s2846_s1 }
  0xb1   : > { %861 = vrot.lane.b32.xlu1 %v858_v20, %s2832_s22  ;;  %s2878_s22 = smov 18  }
  0xb4   : > { %760 = vrot.lane.b32.xlu0 %v603_v24, %s2856_s0 }
  0xb5   : > { %832 = vrot.lane.b32.xlu1 %v829_v23, %s2836_s24  ;;  %v582_v23 = vmul.f32 %v580_v14, %v2311_v61  ;;  %s2885_s24 = smov 110  }
  0xb7   : > { %v752_v33 = vcombine.high %v582_v23, %v582_v23 }
  0xb8   : > { %849 = vrot.lane.b32.xlu0 %v844_v27, %s2834_s20 }
  0xb9   : > { %845 = vrot.lane.b32.xlu1 %v843_v26, %s2834_s20  ;;  %s2883_s20 = smov 112  }
  0xbc   : > { %803 = vrot.lane.b32.xlu0 %v800_v29, %s2840_s23  ;;  %s2884_s23 = smov 111  }
  0xbd   : > { %816 = vrot.lane.b32.xlu1 %v814_v28, %s2838_s28  ;;  %s2880_s28 = smov 33  }
  0xc0   : > { %774 = vrot.lane.b32.xlu0 %v771_v32, %s2846_s1  ;;  %s2879_s1 = smov 32  }
  0xc1   : > { %787 = vrot.lane.b32.xlu1 %v785_v31, %s2844_s19  ;;  %s2877_s19 = smov 17  }
  0xc4   : > { %758 = vrot.lane.b32.xlu0 %v756_v35, %s2856_s0 }
  0xc5   : > { %762 = vrot.lane.b32.xlu1 %v757_v34, %s2856_s0 }
  0xc8   : > { %968 = vperm.xlu0 %2059, %v965_v37   ;;  %v877_v37 = vld [vmem:[%s2876_s3] sm:$0xff] }
  0xc9   : > { %960 = vperm.xlu1 %2058, %v957_v36  }
  0xcc   : > { %2060 = vset.pattern.permute.xlu0 %v2113_v42  ;;  %v1053_v42 = vrot.slane %v2001_v38, %v2242_v8 }
  0xcd   : > { %1032 = vrot.lane.b32.xlu1 %v1027_v39, %s2852_s21  ;;  %1206 = vperm.xlu0 %2060, %v2368_v40   ;;  %v1049_v39 = vrot.slane %v2001_v38, %v2240_v7 }
  0xd1   : > { %1034 = vrot.lane.b32.xlu1 %v1031_v41, %s2852_s21  ;;  %v2114_v41 = vmov 2   ;;  %s2886_s21 = smov 96  }
  0xd2   : > { %2061 = vset.pattern.permute.xlu0 %v2114_v41 }
  0xd3   : > { %1228 = vperm.xlu0 %2061, %v2368_v40  }
  0xd5   : > { %1054 = vrot.lane.b32.xlu1 %v1049_v39, %s2854_s30 }
  0xd9   : > { %1056 = vrot.lane.b32.xlu1 %v1053_v42, %s2854_s30  ;;  %s2887_s30 = smov 95  }
 0x10a   : > { %v864_v44 = vpop.permute.xlu0 %863 }
 0x10b   : > { %v806_v43 = vpop.permute.xlu1 %805 }
 0x10e   : > { %v835_v46 = vpop.permute.xlu0 %834 }
 0x10f   : > { %v777_v45 = vpop.permute.xlu1 %776 }
 0x112   : > { %v831_v48 = vpop.permute.xlu0 %830 }
 0x113   : > { %v848_v47 = vpop.permute.xlu1 %847 }
 0x116   : > { %v819_v50 = vpop.permute.xlu0 %818 }
 0x117   : > { %v860_v49 = vpop.permute.xlu1 %859 }
 0x11a   : > { %v802_v52 = vpop.permute.xlu0 %801 }
 0x11b   : > { %v821_v51 = vpop.permute.xlu1 %820 }
 0x11c   : > { %v824_v15 = vsel %vm822_vm2, %v819_v50, %v821_v51  ;;  %v2118_v51 = vmov 6  }
 0x11e   : > { %v790_v54 = vpop.permute.xlu0 %789 }
 0x11f   : > { %v792_v53 = vpop.permute.xlu1 %791 }
 0x120   : > { %v795_v24 = vsel %vm2860_vm5, %v790_v54, %v792_v53 }
 0x122   : > { %v773_v56 = vpop.permute.xlu0 %772 }
 0x123   : > { %v862_v55 = vpop.permute.xlu1 %861 }
 0x124   : > { %v867_v57 = vsel %vm2848_vm13, %v862_v55, %v864_v44  ;;  %v866_v58 = vsel %vm2848_vm13, %v860_v49, %v862_v55  ;;  %vm2858_vm13 = vcmask 1039360  }
 0x125   : > { %1995 = vmatprep.subr.msk.mxu0 %vm868_vm14, %v867_v57 }
 0x126   : > { %1996 = vmatpush1.msk.msra.mxu0 %vm868_vm14, %v866_v58  ;;  %v761_v60 = vpop.permute.xlu0 %760 }
 0x127   : > { %v833_v59 = vpop.permute.xlu1 %832 }
 0x128   : > { %v837_v4 = vsel %vm836_vm15, %v831_v48, %v833_v59  ;;  %v838_v5 = vsel %vm836_vm15, %v833_v59, %v835_v46  ;;  %v2117_v48 = vmov 5  }
 0x12a   : > { %v850_v0 = vpop.permute.xlu0 %849 }
 0x12b   : > { %v846_v63 = vpop.permute.xlu1 %845  ;;  %v853_v9 = vsel %vm2849_vm0, %v848_v47, %v850_v0 }
 0x12c   : > { %v852_v6 = vsel %vm2849_vm0, %v846_v63, %v848_v47  ;;  %v876_v10 = vsel %vm868_vm14, %v838_v5, %v853_v9  ;;  %vm878_vm0 = vcmask 293888   ;;  %v2003_v47 = vld [vmem:[%s2874_s2 + $0x4] ss:$8 sm:$0x3] }
 0x12d   : > { %v875_v11 = vsel %vm868_vm14, %v837_v4, %v852_v6  ;;  %910 = vmatprep.subr.mxu0 %v876_v10  ;;  %v1093_v49 = vrot.slane %v2003_v47, %v2240_v7 }
 0x12e   : > { %911 = vmatpush1.msra.mxu0 %v875_v11  ;;  %v804_v13 = vpop.permute.xlu0 %803 }
 0x12f   : > { %v817_v12 = vpop.permute.xlu1 %816  ;;  %v808_v17 = vsel %vm807_vm3, %v802_v52, %v804_v13  ;;  %v809_v18 = vsel %vm807_vm3, %v804_v13, %v806_v43  ;;  %v2115_v43 = vmov 3   ;;  %v2004_v52 = vld [vmem:[%s2874_s2 + $0x5] ss:$8 sm:$0x3] }
 0x130   : > { %v823_v16 = vsel %vm822_vm2, %v817_v12, %v819_v50  ;;  %v874_v19 = vsel %vm868_vm14, %v809_v18, %v824_v15  ;;  %2062 = vset.pattern.permute.xlu0 %v2115_v43  ;;  %v1097_v50 = vrot.slane %v2003_v47, %v2242_v8  ;;  %v1115_v53 = vrot.slane %v2004_v52, %v2240_v7  ;;  %v2005_v12 = vld [vmem:[%s2874_s2 + $0x6] ss:$8 sm:$0x3] }
 0x131   : > { %v873_v20 = vsel %vm868_vm14, %v808_v17, %v823_v16  ;;  %912 = vmatprep.subr.mxu0 %v874_v19  ;;  %1250 = vperm.xlu0 %2062, %v2368_v40   ;;  %v1119_v55 = vrot.slane %v2004_v52, %v2242_v8  ;;  %v1137_v14 = vrot.slane %v2005_v12, %v2240_v7  ;;  %v2006_v16 = vld [vmem:[%s2874_s2 + $0x7] ss:$8 sm:$0x3]  ;;  %v2007_v19 = vld [vmem:[%s2874_s2 + $0x10] ss:$8 sm:$0x3] }
 0x132   : > { %913 = vmatpush1.msra.mxu0 %v873_v20  ;;  %v775_v22 = vpop.permute.xlu0 %774  ;;  %v1141_v15 = vrot.slane %v2005_v12, %v2242_v8  ;;  %v1159_v17 = vrot.slane %v2006_v16, %v2240_v7  ;;  %v1163_v18 = vrot.slane %v2006_v16, %v2242_v8  ;;  %v1181_v20 = vrot.slane %v2007_v19, %v2240_v7 }
 0x133   : > { %v788_v21 = vpop.permute.xlu1 %787  ;;  %v779_v26 = vsel %vm2859_vm6, %v773_v56, %v775_v22  ;;  %v780_v27 = vsel %vm2859_vm6, %v775_v22, %v777_v45  ;;  %v2116_v45 = vmov 4   ;;  %v2120_v56 = vmov 8  }
 0x134   : > { %v794_v25 = vsel %vm2860_vm5, %v788_v21, %v790_v54  ;;  %v872_v28 = vsel %vm868_vm14, %v780_v27, %v795_v24  ;;  %v2119_v54 = vmov 7   ;;  %v1185_v21 = vrot.slane %v2007_v19, %v2242_v8 }
 0x135   : > { %v871_v29 = vsel %vm868_vm14, %v779_v26, %v794_v25  ;;  %914 = vmatprep.subr.mxu0 %v872_v28  ;;  %2063 = vset.pattern.permute.xlu0 %v2116_v45 }
 0x136   : > { %915 = vmatpush1.msra.mxu0 %v871_v29  ;;  %v759_v32 = vpop.permute.xlu0 %758  ;;  %1272 = vperm.xlu0 %2063, %v2368_v40  }
 0x137   : > { %v763_v31 = vpop.permute.xlu1 %762  ;;  %v765_v34 = vsel %vm2858_vm13, %v759_v32, %v761_v60 }
 0x138   : > { %v766_v61 = vsel %vm2858_vm13, %v761_v60, %v763_v31  ;;  %v869_v36 = vsel %vm868_vm14, %v582_v23, %v765_v34 }
 0x139   : > { %v870_v35 = vsel %vm868_vm14, %v752_v33, %v766_v61  ;;  %vm1000_vm14 = vcmask 1047688  }
 0x13a   : > { %916 = vmatprep.subr.mxu0 %v870_v35  ;;  %2064 = vset.pattern.permute.xlu0 %v2117_v48 }
 0x13b   : > { %917 = vmatpush1.msra.mxu0 %v869_v36  ;;  %1294 = vperm.xlu0 %2064, %v2368_v40  }
 0x13c   : > { %1997 = vmatmul.mubr.msk.f32.vlgmr.msra.gmra.mxu0 %vm878_vm0, %v877_v37  ;;  %vm2890_vm0 = vcmask 777216  }
 0x13d   : > { %1450 = vmatprep.mubr.f32.mxu0 %v2095_v2  ;;  %v2002_v2 = vld [vmem:[%s2874_s2 + $0x3] ss:$8 sm:$0x3] }
 0x13e   : > { %v1071_v44 = vrot.slane %v2002_v2, %v2240_v7  ;;  %v1075_v46 = vrot.slane %v2002_v2, %v2242_v8 }
 0x13f   : > { %2065 = vset.pattern.permute.xlu0 %v2118_v51 }
 0x140   : > { %1076 = vrot.lane.b32.xlu1 %v1071_v44, %s2850_s18  ;;  %1316 = vperm.xlu0 %2065, %v2368_v40  }
 0x143   : > { %v969_v59 = vpop.permute.xlu0 %968 }
 0x144   : > { %1078 = vrot.lane.b32.xlu1 %v1075_v46, %s2850_s18  ;;  %2066 = vset.pattern.permute.xlu0 %v2119_v54  ;;  %v961_v57 = vpop.permute.xlu1 %960  ;;  %s2881_s18 = smov 34  }
 0x145   : > { %1338 = vperm.xlu0 %2066, %v2368_v40  }
 0x148   : > { %1098 = vrot.lane.b32.xlu1 %v1093_v49, %s2877_s19  ;;  %v2470_v22 = vpop.permute.xlu1 %1032  ;;  %v2486_v31 = vpop.permute.xlu0 %1206 }
 0x149   : > { %2067 = vset.pattern.permute.xlu0 %v2120_v56 }
 0x14a   : > { %1360 = vperm.xlu0 %2067, %v2368_v40  }
 0x14c   : > { %1100 = vrot.lane.b32.xlu1 %v1097_v50, %s2877_s19  ;;  %v2472_v23 = vpop.permute.xlu1 %1034 }
 0x14d   : > { %v1036_v12 = vsel %vm599_vm12, %v2470_v22, %v2472_v23 }
 0x14e   : > { %2068 = vset.pattern.permute.xlu0 %v2112_v30  ;;  %v2490_v33 = vpop.permute.xlu0 %1228 }
 0x14f   : > { %1200 = vperm.xlu0 %2068, %v2368_v40  }
 0x150   : > { %1120 = vrot.lane.b32.xlu1 %v1115_v53, %s2878_s22  ;;  %v2474_v24 = vpop.permute.xlu1 %1054 }
 0x154   : > { %1122 = vrot.lane.b32.xlu1 %v1119_v55, %s2878_s22  ;;  %v2476_v25 = vpop.permute.xlu1 %1056 }
 0x1ac   : > { %v2494_v34 = vpop.permute.xlu0 %1250 }
 0x1b1   : > { %v2497_v36 = vpop.permute.xlu0 %1272 }
 0x1b2   : > { %v2478_v26 = vpop.permute.xlu1 %1076 }
 0x1b6   : > { %v2480_v27 = vpop.permute.xlu1 %1078  ;;  %v2511_v2 = vpop.permute.xlu0 %1294 }
 0x1ba   : > { %v2482_v28 = vpop.permute.xlu1 %1098 }
 0x1bb   : > { %v2527_v53 = vpop.permute.xlu0 %1316 }
 0x1be   : > { %v2484_v29 = vpop.permute.xlu1 %1100 }
 0x1c2   : > { %v2488_v32 = vpop.permute.xlu1 %1120 }
 0x1c6   : > { %v2492_v61 = vpop.permute.xlu1 %1122 }
 0x1c7   : > { %v1124_v19 = vsel %vm682_vm9, %v2488_v32, %v2492_v61 }
 0x1fc   : > { %v952_v58 = vpop.f32.mrf.mxu0 }
 0x1fd   : > { %v963_v60 = vmul.f32 %v961_v57, %v952_v58 }
 0x1fe   : > { %v954_v62 = vpop.f32.mrf.mxu0 }
 0x1ff   : > { %v964_v63 = vmul.f32 %v961_v57, %v954_v62  ;;  %v971_v0 = vadd.f32 %v969_v59, %v963_v60  ;;  %v1339_v60 = vpop.permute.xlu0 %1338 }
 0x201   : > { %v972_v1 = vadd.f32 %v969_v59, %v964_v63  ;;  %v1998_v3 = vmul.f32 -1.442695, %v971_v0 }
 0x203   : > { %2070 = vpow2.f32 %v1998_v3  ;;  %v1999_v4 = vmul.f32 -1.442695, %v972_v1 }
 0x205   : > { %2072 = vpow2.f32 %v1999_v4 }
 0x210   : > { %v2071_v5 = vpop.eup %2070 }
 0x211   : > { %v979_v6 = vadd.f32 1.0, %v2071_v5 }
 0x212   : > { %v2073_v9 = vpop.eup %2072 }
 0x213   : > { %v980_v10 = vadd.f32 1.0, %v2073_v9  ;;  %2074 = vrcp.f32 %v979_v6 }
 0x215   : > { %2076 = vrcp.f32 %v980_v10 }
 0x220   : > { %v2075_v30 = vpop.eup %2074 }
 0x221   : > { %v985_v40 = vmul.f32 %v2075_v30, %v971_v0 }
 0x222   : > { %v2077_v11 = vpop.eup %2076 }
 0x223   : > { %992 = vrot.lane.b32.xlu1 %v985_v40, %s2877_s19  ;;  %v986_v13 = vmul.f32 %v2077_v11, %v972_v1 }
 0x227   : > { %994 = vrot.lane.b32.xlu1 %v986_v13, %s2877_s19  ;;  %v1080_v13 = vsel %vm641_vm10, %v2478_v26, %v2480_v27 }
 0x22b   : > { %1142 = vrot.lane.b32.xlu1 %v1137_v14, %s2879_s1 }
 0x22f   : > { %1144 = vrot.lane.b32.xlu1 %v1141_v15, %s2879_s1 }
 0x233   : > { %1164 = vrot.lane.b32.xlu1 %v1159_v17, %s2880_s28 }
 0x237   : > { %1166 = vrot.lane.b32.xlu1 %v1163_v18, %s2880_s28  ;;  %v1058_v18 = vsel %vm620_vm11, %v2474_v24, %v2476_v25 }
 0x23b   : > { %1186 = vrot.lane.b32.xlu1 %v1181_v20, %s2881_s18 }
 0x23f   : > { %1188 = vrot.lane.b32.xlu1 %v1185_v21, %s2881_s18 }
 0x295   : > { %v993_v35 = vpop.permute.xlu1 %992 }
 0x296   : > { %1001 = vst.msk [vmem:[#allocation3] sm:$0xff] %vm1000_vm14, %v993_v35 }
 0x299   : > { %v995_v37 = vpop.permute.xlu1 %994 }
 0x29a   : > { %v2500_v38 = vsel %vm559_vm4, %v993_v35, %v995_v37  ;;  %1003 = vst.msk [vmem:[#allocation3 + $0x10] sm:$0xff] %vm559_vm4, %v995_v37 }
 0x29b   : > { %v1041_v16 = vmul.f32 %v1036_v12, %v2500_v38  ;;  %v1085_v17 = vmul.f32 %v1080_v13, %v2500_v38 }
 0x29d   : > { %v2503_v39 = vld [vmem:[#allocation3] sm:$0xff]  ;;  %v2505_v41 = vpop.permute.xlu1 %1142  ;;  %v1210_v21 = vmul.f32 %v2486_v31, %v1041_v16 }
 0x29e   : > { %v1040_v42 = vmul.f32 %v2470_v22, %v2503_v39  ;;  %v1062_v43 = vmul.f32 %v2474_v24, %v2503_v39  ;;  %v1084_v46 = vmul.f32 %v2478_v26, %v2503_v39  ;;  %v1106_v47 = vmul.f32 %v2482_v28, %v2503_v39 }
 0x29f   : > { %v1150_v49 = vmul.f32 %v2505_v41, %v2503_v39  ;;  %v1128_v52 = vmul.f32 %v2488_v32, %v2503_v39  ;;  %v1254_v22 = vmul.f32 %v2494_v34, %v1085_v17  ;;  %v1129_v26 = vmul.f32 %v1124_v19, %v2500_v38 }
 0x2a0   : > { %v1209_v44 = vmul.f32 %v2486_v31, %v1040_v42  ;;  %v1231_v45 = vmul.f32 %v2490_v33, %v1062_v43  ;;  %v1253_v50 = vmul.f32 %v2494_v34, %v1084_v46  ;;  %v1275_v51 = vmul.f32 %v2497_v36, %v1106_v47  ;;  %v1361_v43 = vpop.permute.xlu0 %1360 }
 0x2a1   : > { %v1145_v48 = vpop.permute.xlu1 %1144  ;;  %v1020_v54 = vld [vmem:[#allocation3 + $0x10] sm:$0xff]  ;;  %v1319_v56 = vmul.f32 %v2527_v53, %v1150_v49  ;;  %v1297_v58 = vmul.f32 %v2511_v2, %v1128_v52  ;;  %v1102_v24 = vsel %vm559_vm4, %v2482_v28, %v2484_v29  ;;  %v1298_v32 = vmul.f32 %v2511_v2, %v1129_v26 }
 0x2a2   : > { %1215 = vrot.lane.b32.xlu0 %v1209_v44, %s2856_s0  ;;  %1237 = vrot.lane.b32.xlu1 %v1231_v45, %s2882_s11  ;;  %v1042_v59 = vmul.f32 %v2472_v23, %v1020_v54  ;;  %v1086_v0 = vmul.f32 %v2480_v27, %v1020_v54  ;;  %v1064_v1 = vmul.f32 %v2476_v25, %v1020_v54 }
 0x2a3   : > { %v1130_v5 = vmul.f32 %v2492_v61, %v1020_v54  ;;  %v1108_v6 = vmul.f32 %v2484_v29, %v1020_v54  ;;  %v1152_v10 = vmul.f32 %v1145_v48, %v1020_v54  ;;  %v1063_v23 = vmul.f32 %v1058_v18, %v2500_v38 }
 0x2a4   : > { %v1211_v63 = vmul.f32 %v2486_v31, %v1042_v59  ;;  %v1255_v3 = vmul.f32 %v2494_v34, %v1086_v0  ;;  %v1233_v4 = vmul.f32 %v2490_v33, %v1064_v1  ;;  %v1107_v61 = vmul.f32 %v1102_v24, %v2500_v38  ;;  %v1201_v49 = vpop.permute.xlu0 %1200 }
 0x2a5   : > { %v1165_v55 = vpop.permute.xlu1 %1164  ;;  %v1299_v40 = vmul.f32 %v2511_v2, %v1130_v5  ;;  %v1277_v11 = vmul.f32 %v2497_v36, %v1108_v6  ;;  %v1321_v14 = vmul.f32 %v2527_v53, %v1152_v10  ;;  %v1232_v31 = vmul.f32 %v2490_v33, %v1063_v23 }
 0x2a6   : > { %1259 = vrot.lane.b32.xlu0 %v1253_v50, %s2883_s20  ;;  %1281 = vrot.lane.b32.xlu1 %v1275_v51, %s2884_s23  ;;  %v1172_v57 = vmul.f32 %v1165_v55, %v2503_v39  ;;  %v1146_v34 = vsel %vm703_vm7, %v2505_v41, %v1145_v48  ;;  %v1276_v28 = vmul.f32 %v2497_v36, %v1107_v61  ;;  %v1457_v36 = vld [vmem:[%s2889_s8] sm:$0xff]  ;;  %s2896_s8 = smov 1  }
 0x2a7   : > { %v1151_v37 = vmul.f32 %v1146_v34, %v2500_v38  ;;  %v1465_v48 = vld [vmem:[%s2813_s9] sm:$0xff] }
 0x2a8   : > { %v1341_v62 = vmul.f32 %v1339_v60, %v1172_v57 }
 0x2a9   : > { %v1167_v9 = vpop.permute.xlu1 %1166  ;;  %v1320_v44 = vmul.f32 %v2527_v53, %v1151_v37 }
 0x2aa   : > { %1303 = vrot.lane.b32.xlu0 %v1297_v58, %s2885_s24  ;;  %1325 = vrot.lane.b32.xlu1 %v1319_v56, %s2886_s21  ;;  %v1174_v30 = vmul.f32 %v1167_v9, %v1020_v54  ;;  %v1168_v27 = vsel %vm724_vm8, %v1165_v55, %v1167_v9 }
 0x2ab   : > { %v1173_v25 = vmul.f32 %v1168_v27, %v2500_v38 }
 0x2ac   : > { %v1343_v15 = vmul.f32 %v1339_v60, %v1174_v30 }
 0x2ad   : > { %v1187_v20 = vpop.permute.xlu1 %1186  ;;  %v1342_v29 = vmul.f32 %v1339_v60, %v1173_v25  ;;  %v1006_v60 = vld [vmem:[%s2874_s2] ss:$8 sm:$0x3]  ;;  %s2909_s2 = sshll.u32 %s2911_s27, 3 }
 0x2ae   : > { %1219 = vrot.lane.b32.xlu1 %v1211_v63, %s2856_s0  ;;  %1347 = vrot.lane.b32.xlu0 %v1341_v62, %s2887_s30  ;;  %v1194_v45 = vmul.f32 %v1187_v20, %v2503_v39  ;;  %v1011_v0 = vrot.slane %v1006_v60, %v2240_v7  ;;  %v1015_v1 = vrot.slane %v1006_v60, %v2242_v8  ;;  %s550_s3 = scalar_lea.vmem %s2821_s17, %s2909_s2 }
 0x2b0   : > { %v1363_v47 = vmul.f32 %v1361_v43, %v1194_v45  ;;  %v1018_v5 = vmul.f32 %v1011_v0, %v2503_v39  ;;  %v1019_v6 = vmul.f32 %v1015_v1, %v2500_v38  ;;  %v1477_v0 = vld [vmem:[%s2814_s10] sm:$0xff] }
 0x2b1   : > { %v1189_v35 = vpop.permute.xlu1 %1188 }
 0x2b2   : > { %1263 = vrot.lane.b32.xlu1 %v1255_v3, %s2883_s20  ;;  %1241 = vrot.lane.b32.xlu0 %v1233_v4, %s2882_s11  ;;  %v1196_v42 = vmul.f32 %v1189_v35, %v1020_v54  ;;  %v1190_v33 = vsel %vm745_vm1, %v1187_v20, %v1189_v35  ;;  %v1204_v12 = vmul.f32 %v1201_v49, %v1019_v6 }
 0x2b3   : > { %v1195_v41 = vmul.f32 %v1190_v33, %v2500_v38 }
 0x2b4   : > { %v1365_v2 = vmul.f32 %v1361_v43, %v1196_v42 }
 0x2b5   : > { %v1364_v46 = vmul.f32 %v1361_v43, %v1195_v41 }
 0x2b6   : > { %1307 = vrot.lane.b32.xlu1 %v1299_v40, %s2885_s24  ;;  %1285 = vrot.lane.b32.xlu0 %v1277_v11, %s2884_s23  ;;  %v1203_v11 = vmul.f32 %v1201_v49, %v1018_v5 }
 0x2ba   : > { %1351 = vrot.lane.b32.xlu1 %v1343_v15, %s2887_s30  ;;  %1329 = vrot.lane.b32.xlu0 %v1321_v14, %s2886_s21 }
 0x2be   : > { %1217 = vrot.lane.b32.xlu1 %v1210_v21, %s2856_s0  ;;  %1261 = vrot.lane.b32.xlu0 %v1254_v22, %s2883_s20  ;;  %s2888_s0 = smov 94  }
 0x2c2   : > { %1239 = vrot.lane.b32.xlu1 %v1232_v31, %s2882_s11  ;;  %1305 = vrot.lane.b32.xlu0 %v1298_v32, %s2885_s24 }
 0x2c6   : > { %1283 = vrot.lane.b32.xlu1 %v1276_v28, %s2884_s23  ;;  %1349 = vrot.lane.b32.xlu0 %v1342_v29, %s2887_s30 }
 0x2ca   : > { %1327 = vrot.lane.b32.xlu1 %v1320_v44, %s2886_s21  ;;  %1373 = vrot.lane.b32.xlu0 %v1365_v2, %s2888_s0 }
 0x2ce   : > { %1460 = vperm.xlu0 %2068, %v1457_v36   ;;  %1371 = vrot.lane.b32.xlu1 %v1364_v46, %s2888_s0 }
 0x2d2   : > { %1369 = vrot.lane.b32.xlu1 %v1363_v47, %s2888_s0 }
 0x2d6   : > { %1468 = vperm.xlu1 %2058, %v1465_v48  }
 0x314   : > { %v1238_v50 = vpop.permute.xlu1 %1237  ;;  %v1216_v51 = vpop.permute.xlu0 %1215 }
 0x318   : > { %v1282_v52 = vpop.permute.xlu1 %1281  ;;  %v1260_v53 = vpop.permute.xlu0 %1259 }
 0x31c   : > { %v1326_v54 = vpop.permute.xlu1 %1325  ;;  %v1304_v55 = vpop.permute.xlu0 %1303 }
 0x320   : > { %v1220_v56 = vpop.permute.xlu1 %1219  ;;  %v1348_v57 = vpop.permute.xlu0 %1347 }
 0x324   : > { %v1264_v58 = vpop.permute.xlu1 %1263  ;;  %v1242_v59 = vpop.permute.xlu0 %1241 }
 0x328   : > { %v1308_v62 = vpop.permute.xlu1 %1307  ;;  %v1286_v63 = vpop.permute.xlu0 %1285 }
 0x32c   : > { %v1352_v3 = vpop.permute.xlu1 %1351  ;;  %v1330_v4 = vpop.permute.xlu0 %1329 }
 0x330   : > { %v1218_v9 = vpop.permute.xlu1 %1217  ;;  %v1262_v10 = vpop.permute.xlu0 %1261 }
 0x331   : > { %v1221_v30 = vsel %vm2858_vm13, %v1216_v51, %v1218_v9  ;;  %v1222_v40 = vsel %vm2858_vm13, %v1218_v9, %v1220_v56  ;;  %v1265_v38 = vsel %vm2860_vm5, %v1260_v53, %v1262_v10  ;;  %v1266_v20 = vsel %vm2860_vm5, %v1262_v10, %v1264_v58  ;;  %v1381_v51 = vld [vmem:[%s2894_s7] sm:$0xff] }
 0x332   : > { %v1225_v13 = vadd.f32 %v1221_v30, %v1203_v11  ;;  %v1226_v14 = vadd.f32 %v1222_v40, %v1204_v12  ;;  %vm2891_vm13 = vcmask 769024   ;;  %v1486_v11 = vld [vmem:[#allocation5] sm:$0x1] }
 0x333   : > { %vm2893_vm5 = vmmov %vm2891_vm13 }
 0x334   : > { %v1240_v15 = vpop.permute.xlu1 %1239  ;;  %v1306_v16 = vpop.permute.xlu0 %1305 }
 0x335   : > { %v1243_v17 = vsel %vm2859_vm6, %v1238_v50, %v1240_v15  ;;  %v1244_v18 = vsel %vm2859_vm6, %v1240_v15, %v1242_v59  ;;  %v1309_v32 = vsel %vm822_vm2, %v1304_v55, %v1306_v16  ;;  %v1310_v61 = vsel %vm822_vm2, %v1306_v16, %v1308_v62  ;;  %vm2892_vm6 = vmmov %vm2890_vm0  ;;  %v2016_v62 = vld [vmem:[%s2870_s29 + $0x6] ss:$8 sm:$0x3] }
 0x336   : > { %v1247_v19 = vadd.f32 %v1243_v17, %v1225_v13  ;;  %v1248_v39 = vadd.f32 %v1244_v18, %v1226_v14 }
 0x338   : > { %v1284_v21 = vpop.permute.xlu1 %1283  ;;  %v1269_v22 = vadd.f32 %v1265_v38, %v1247_v19  ;;  %v1270_v23 = vadd.f32 %v1266_v20, %v1248_v39  ;;  %v1350_v31 = vpop.permute.xlu0 %1349  ;;  %v1495_v19 = vld [vmem:[%s2816_s12] sm:$0xff] }
 0x339   : > { %v1287_v26 = vsel %vm807_vm3, %v1282_v52, %v1284_v21  ;;  %v1288_v27 = vsel %vm807_vm3, %v1284_v21, %v1286_v63  ;;  %v1354_v33 = vsel %vm2890_vm0, %v1350_v31, %v1352_v3  ;;  %v1353_v46 = vsel %vm2892_vm6, %v1348_v57, %v1350_v31  ;;  %v1502_v38 = vld [vmem:[%s2817_s13] sm:$0xff] }
 0x33a   : > { %v1291_v24 = vadd.f32 %v1287_v26, %v1269_v22  ;;  %v1292_v25 = vadd.f32 %v1288_v27, %v1270_v23  ;;  %vm1382_vm0 = vcmask 64512   ;;  %v1664_v63 = vrot.slane %v2016_v62, %v2242_v8  ;;  %v2018_v27 = vld [vmem:[%s2870_s29 + $0x10] ss:$8 sm:$0x3] }
 0x33c   : > { %v1328_v34 = vpop.permute.xlu1 %1327  ;;  %v1313_v35 = vadd.f32 %v1309_v32, %v1291_v24  ;;  %v1314_v37 = vadd.f32 %v1310_v61, %v1292_v25  ;;  %v1374_v41 = vpop.permute.xlu0 %1373  ;;  %v2012_v24 = vld [vmem:[%s2870_s29 + $0x2] ss:$8 sm:$0x3]  ;;  %v1702_v32 = vrot.slane %v2018_v27, %v2240_v7  ;;  %v2011_v61 = vld [vmem:[%s2870_s29 + $0x1] ss:$8 sm:$0x3] }
 0x33d   : > { %v1331_v42 = vsel %vm836_vm15, %v1326_v54, %v1328_v34  ;;  %v1332_v28 = vsel %vm836_vm15, %v1328_v34, %v1330_v4  ;;  %v1576_v31 = vrot.slane %v2012_v24, %v2240_v7  ;;  %v1555_v34 = vrot.slane %v2011_v61, %v2240_v7 }
 0x33e   : > { %v1336_v29 = vadd.f32 %v1332_v28, %v1314_v37  ;;  %v1335_v43 = vadd.f32 %v1331_v42, %v1313_v35  ;;  %v1706_v35 = vrot.slane %v2018_v27, %v2242_v8  ;;  %v2017_v37 = vld [vmem:[%s2870_s29 + $0x7] ss:$8 sm:$0x3] }
 0x33f   : > { %v1681_v42 = vrot.slane %v2017_v37, %v2240_v7  ;;  %v1685_v28 = vrot.slane %v2017_v37, %v2242_v8 }
 0x340   : > { %v1372_v2 = vpop.permute.xlu1 %1371  ;;  %v1358_v44 = vadd.f32 %v1354_v33, %v1336_v29  ;;  %v1357_v48 = vadd.f32 %v1353_v46, %v1335_v43  ;;  %v1660_v29 = vrot.slane %v2016_v62, %v2240_v7  ;;  %v2015_v33 = vld [vmem:[%s2870_s29 + $0x5] ss:$8 sm:$0x3] }
 0x341   : > { %v1376_v36 = vsel %vm2891_vm13, %v1372_v2, %v1374_v41  ;;  %v1639_v43 = vrot.slane %v2015_v33, %v2240_v7  ;;  %v1643_v41 = vrot.slane %v2015_v33, %v2242_v8  ;;  %vm2907_vm13 = vcmask 1039360  }
 0x342   : > { %v1380_v45 = vadd.f32 %v1376_v36, %v1358_v44  ;;  %v2014_v36 = vld [vmem:[%s2870_s29 + $0x4] ss:$8 sm:$0x3] }
 0x343   : > { %v1618_v46 = vrot.slane %v2014_v36, %v2240_v7 }
 0x344   : > { %v1370_v47 = vpop.permute.xlu1 %1369  ;;  %1416 = vmatprep.subr.mxu0 %v1380_v45 }
 0x345   : > { %v1375_v49 = vsel %vm2893_vm5, %v1370_v47, %v1372_v2  ;;  %v1622_v47 = vrot.slane %v2014_v36, %v2242_v8 }
 0x346   : > { %v1379_v50 = vadd.f32 %v1375_v49, %v1357_v48  ;;  %v2013_v48 = vld [vmem:[%s2870_s29 + $0x3] ss:$8 sm:$0x3] }
 0x347   : > { %v1597_v49 = vrot.slane %v2013_v48, %v2240_v7 }
 0x348   : > { %1417 = vmatpush1.msra.mxu0 %v1379_v50  ;;  %v1601_v50 = vrot.slane %v2013_v48, %v2242_v8 }
 0x349   : > { %2008 = vmatmul.mubr.msk.f32.vlgmr.msra.gmra.mxu0 %vm1382_vm0, %v1381_v51  ;;  %v1461_v52 = vpop.permute.xlu0 %1460  ;;  %v1580_v51 = vrot.slane %v2012_v24, %v2242_v8 }
 0x351   : > { %v1469_v58 = vpop.permute.xlu1 %1468 }
 0x409   : > { %v1452_v53 = vpop.f32.mrf.mxu0 }
 0x40a   : > { %v1463_v54 = vmul.f32 %v1461_v52, %v1452_v53 }
 0x40b   : > { %v1454_v55 = vpop.f32.mrf.mxu0 }
 0x40c   : > { %v1464_v56 = vmul.f32 %v1461_v52, %v1454_v55  ;;  %v2631_v57 = vadd.f32 %v1469_v58, %v1463_v54  ;;  %v1559_v52 = vrot.slane %v2011_v61, %v2242_v8 }
 0x40e   : > { %v2633_v59 = vadd.f32 %v1469_v58, %v1464_v56 }
 0x410   : > { %v1473_v60 = vadd.f32 %v2633_v59, %v2631_v57 }
 0x412   : > { %1474 = vadd.xlane.f32.xlu0 %v1473_v60 }
 0x428   : > { %1667 = vrot.lane.b32.xlu0 %v1664_v63, %s2879_s1 }
 0x42c   : > { %1581 = vrot.lane.b32.xlu0 %v1576_v31, %s2895_s4 }
 0x430   : > { %1560 = vrot.lane.b32.xlu0 %v1555_v34, %s2896_s8 }
 0x49b   : > { %v1475_v1 = vpop.xlane.xlu0 %1474 }
 0x49c   : > { %v1476_v3 = vmul.f32 0.00390625, %v1475_v1 }
 0x49e   : > { %v1478_v4 = vmul.f32 %v1477_v0, %v1476_v3 }
 0x4a0   : > { %v1479_v5 = vsel %vm599_vm12, %v1478_v4, 0.0 }
 0x4a1   : > { %v1480_v6 = vrot.slane %v1479_v5, 4 }
 0x4a3   : > { %v1481_v9 = vadd.f32 %v1480_v6, %v1479_v5 }
 0x4a5   : > { %v1482_v10 = vrot.slane %v1481_v9, 2 }
 0x4a7   : > { %v1483_v30 = vadd.f32 %v1482_v10, %v1481_v9 }
 0x4a9   : > { %v1484_v40 = vrot.slane %v1483_v30, 1 }
 0x4ab   : > { %v1485_v12 = vadd.f32 %v1484_v40, %v1483_v30  ;;  %v1668_v40 = vpop.permute.xlu0 %1667 }
 0x4ad   : > { %v1487_v13 = vadd.f32 %v1486_v11, %v1485_v12 }
 0x4af   : > { %v2009_v14 = vmul.f32 -1.442695, %v1487_v13 }
 0x4b1   : > { %2078 = vpow2.f32 %v2009_v14 }
 0x4be   : > { %v2079_v15 = vpop.eup %2078 }
 0x4bf   : > { %v1491_v16 = vadd.f32 1.0, %v2079_v15 }
 0x4c1   : > { %2080 = vrcp.f32 %v1491_v16 }
 0x4ce   : > { %v2081_v17 = vpop.eup %2080 }
 0x4cf   : > { %v1494_v18 = vmul.f32 %v2081_v17, %v1487_v13 }
 0x4d1   : > { %v1499_v39 = vrot.slane %v1494_v18, %v2240_v7 }
 0x4d3   : > { %v1500_v20 = vmul.f32 %v1499_v39, %v1495_v19  ;;  %v1582_v19 = vpop.permute.xlu0 %1581 }
 0x4d5   : > { %v1503_v21 = vadd.f32 %v1502_v38, %v1500_v20 }
 0x4d7   : > { %v2010_v22 = vmul.f32 -1.442695, %v1503_v21 }
 0x4d9   : > { %2082 = vpow2.f32 %v2010_v22 }
 0x4e6   : > { %v2083_v23 = vpop.eup %2082 }
 0x4e7   : > { %v1507_v26 = vadd.f32 1.0, %v2083_v23 }
 0x4e9   : > { %2084 = vrcp.f32 %v1507_v26 }
 0x4f6   : > { %v2085_v25 = vpop.eup %2084 }
 0x4f7   : > { %1512 = vperm.xlu1 %2058, %v2085_v25  }
 0x4fb   : > { %1707 = vrot.lane.b32.xlu1 %v1702_v32, %s2881_s18 }
 0x4ff   : > { %1709 = vrot.lane.b32.xlu1 %v1706_v35, %s2881_s18 }
 0x503   : > { %1686 = vrot.lane.b32.xlu1 %v1681_v42, %s2880_s28 }
 0x507   : > { %1688 = vrot.lane.b32.xlu1 %v1685_v28, %s2880_s28  ;;  %v1561_v28 = vpop.permute.xlu0 %1560 }
 0x50b   : > { %1665 = vrot.lane.b32.xlu1 %v1660_v29, %s2879_s1 }
 0x50f   : > { %1644 = vrot.lane.b32.xlu1 %v1639_v43, %s2878_s22 }
 0x513   : > { %1646 = vrot.lane.b32.xlu1 %v1643_v41, %s2878_s22 }
 0x572   : > { %v1513_v2 = vpop.permute.xlu1 %1512 }
 0x573   : > { %v1515_v44 = vmul.f32 %v1513_v2, %v2631_v57  ;;  %v1516_v45 = vmul.f32 %v1513_v2, %v2633_v59 }
 0x575   : > { %1522 = vrot.lane.b32.xlu1 %v1515_v44, %s2877_s19  ;;  %v1898_v44 = vld [vmem:[%s2819_s15] sm:$0xf] }
 0x576   : > { %v1708_v53 = vpop.permute.xlu1 %1707 }
 0x579   : > { %1524 = vrot.lane.b32.xlu1 %v1516_v45, %s2877_s19  ;;  %v1906_v45 = vld [vmem:[%s2820_s16] sm:$0xf] }
 0x57a   : > { %v1710_v54 = vpop.permute.xlu1 %1709 }
 0x57b   : > { %v1711_v21 = vsel %vm745_vm1, %v1708_v53, %v1710_v54  ;;  %vm2899_vm1 = vmmov %vm2893_vm5 }
 0x57d   : > { %1623 = vrot.lane.b32.xlu1 %v1618_v46, %s2877_s19 }
 0x57e   : > { %v1687_v55 = vpop.permute.xlu1 %1686 }
 0x581   : > { %1625 = vrot.lane.b32.xlu1 %v1622_v47, %s2877_s19 }
 0x582   : > { %v1689_v56 = vpop.permute.xlu1 %1688 }
 0x583   : > { %v1690_v26 = vsel %vm724_vm8, %v1687_v55, %v1689_v56  ;;  %vm2902_vm8 = vmmov %vm2892_vm6 }
 0x585   : > { %1602 = vrot.lane.b32.xlu1 %v1597_v49, %s2897_s6 }
 0x586   : > { %v1666_v58 = vpop.permute.xlu1 %1665 }
 0x587   : > { %v1669_v27 = vsel %vm703_vm7, %v1666_v58, %v1668_v40  ;;  %vm2901_vm7 = vmmov %vm2892_vm6 }
 0x589   : > { %1604 = vrot.lane.b32.xlu1 %v1601_v50, %s2897_s6 }
 0x58a   : > { %v1645_v57 = vpop.permute.xlu1 %1644 }
 0x58d   : > { %1583 = vrot.lane.b32.xlu1 %v1580_v51, %s2895_s4 }
 0x58e   : > { %v1647_v59 = vpop.permute.xlu1 %1646 }
 0x58f   : > { %v1648_v32 = vsel %vm682_vm9, %v1645_v57, %v1647_v59  ;;  %vm2903_vm9 = vcmask 916480  }
 0x591   : > { %1562 = vrot.lane.b32.xlu1 %v1559_v52, %s2896_s8 }
 0x5e7   : > { %v1523_v60 = vpop.permute.xlu1 %1522 }
 0x5e8   : > { %1530 = vst.msk [vmem:[#allocation4] sm:$0xff] %vm1000_vm14, %v1523_v60 }
 0x5eb   : > { %v1525_v62 = vpop.permute.xlu1 %1524 }
 0x5ec   : > { %v2710_v63 = vsel %vm559_vm4, %v1523_v60, %v1525_v62  ;;  %1532 = vst.msk [vmem:[#allocation4 + $0x10] sm:$0xff] %vm559_vm4, %v1525_v62 }
 0x5ed   : > { %v1716_v23 = vmul.f32 %v1711_v21, %v2710_v63  ;;  %v1695_v24 = vmul.f32 %v1690_v26, %v2710_v63  ;;  %v1674_v25 = vmul.f32 %v1669_v27, %v2710_v63  ;;  %v1653_v34 = vmul.f32 %v1648_v32, %v2710_v63  ;;  %v1822_v32 = vld [vmem:[%s2818_s14] sm:$0xf] }
 0x5ef   : > { %v2713_v0 = vld [vmem:[#allocation4] sm:$0xff]  ;;  %v1624_v1 = vpop.permute.xlu1 %1623 }
 0x5f0   : > { %v1715_v3 = vmul.f32 %v1708_v53, %v2713_v0  ;;  %v1694_v10 = vmul.f32 %v1687_v55, %v2713_v0  ;;  %v1673_v30 = vmul.f32 %v1666_v58, %v2713_v0  ;;  %v1631_v14 = vmul.f32 %v1624_v1, %v2713_v0 }
 0x5f1   : > { %v1652_v15 = vmul.f32 %v1645_v57, %v2713_v0  ;;  %v1589_v39 = vmul.f32 %v1582_v19, %v2713_v0  ;;  %v1568_v36 = vmul.f32 %v1561_v28, %v2713_v0 }
 0x5f2   : > { %1812 = vrot.lane.b32.xlu0 %v1715_v3, %s2888_s0 }
 0x5f3   : > { %v1549_v4 = vld [vmem:[#allocation4 + $0x10] sm:$0xff]  ;;  %v1626_v9 = vpop.permute.xlu1 %1625 }
 0x5f4   : > { %v1717_v5 = vmul.f32 %v1710_v54, %v1549_v4  ;;  %v1696_v6 = vmul.f32 %v1689_v56, %v1549_v4  ;;  %v1654_v12 = vmul.f32 %v1647_v59, %v1549_v4  ;;  %v1675_v13 = vmul.f32 %v1668_v40, %v1549_v4 }
 0x5f5   : > { %v1633_v17 = vmul.f32 %v1626_v9, %v1549_v4  ;;  %v1627_v31 = vsel %vm559_vm4, %v1624_v1, %v1626_v9  ;;  %vm2900_vm4 = vmmov %vm2899_vm1 }
 0x5f6   : > { %1816 = vrot.lane.b32.xlu1 %v1717_v5, %s2888_s0  ;;  %1803 = vrot.lane.b32.xlu0 %v1696_v6, %s2887_s30  ;;  %v1632_v61 = vmul.f32 %v1627_v31, %v2710_v63 }
 0x5f7   : > { %v1603_v11 = vpop.permute.xlu1 %1602 }
 0x5f8   : > { %v1610_v38 = vmul.f32 %v1603_v11, %v2713_v0 }
 0x5fa   : > { %1799 = vrot.lane.b32.xlu1 %v1694_v10, %s2887_s30  ;;  %1786 = vrot.lane.b32.xlu0 %v1673_v30, %s2886_s21 }
 0x5fb   : > { %v1605_v16 = vpop.permute.xlu1 %1604 }
 0x5fc   : > { %v1612_v18 = vmul.f32 %v1605_v16, %v1549_v4  ;;  %v1606_v35 = vsel %vm641_vm10, %v1603_v11, %v1605_v16  ;;  %vm2904_vm10 = vmmov %vm2903_vm9 }
 0x5fd   : > { %v1611_v29 = vmul.f32 %v1606_v35, %v2710_v63 }
 0x5fe   : > { %1777 = vrot.lane.b32.xlu0 %v1654_v12, %s2885_s24  ;;  %1790 = vrot.lane.b32.xlu1 %v1675_v13, %s2886_s21 }
 0x5ff   : > { %v1584_v20 = vpop.permute.xlu1 %1583 }
 0x600   : > { %v1591_v22 = vmul.f32 %v1584_v20, %v1549_v4  ;;  %v1585_v37 = vsel %vm620_vm11, %v1582_v19, %v1584_v20  ;;  %v1535_v19 = vld [vmem:[%s2870_s29] ss:$8 sm:$0x3]  ;;  %vm2905_vm11 = vcmask 1031168  }
 0x601   : > { %v1590_v33 = vmul.f32 %v1585_v37, %v2710_v63  ;;  %v1540_v26 = vrot.slane %v1535_v19, %v2240_v7  ;;  %v2086_v37 = vld [vmem:[%s2252_s25] sm:$0xff] }
 0x602   : > { %1760 = vrot.lane.b32.xlu0 %v1631_v14, %s2884_s23  ;;  %1773 = vrot.lane.b32.xlu1 %v1652_v15, %s2885_s24 }
 0x603   : > { %v1563_v42 = vpop.permute.xlu1 %1562  ;;  %v1547_v31 = vmul.f32 %v1540_v26, %v2713_v0 }
 0x604   : > { %v1564_v43 = vsel %vm599_vm12, %v1561_v28, %v1563_v42  ;;  %v1570_v2 = vmul.f32 %v1563_v42, %v1549_v4  ;;  %vm2906_vm12 = vmmov %vm2905_vm11  ;;  %v1914_v42 = vcombine.high %v2086_v37, %v2086_v37 }
 0x605   : > { %v1569_v41 = vmul.f32 %v1564_v43, %v2710_v63 }
 0x606   : > { %1751 = vrot.lane.b32.xlu0 %v1612_v18, %s2883_s20  ;;  %1764 = vrot.lane.b32.xlu1 %v1633_v17, %s2884_s23 }
 0x60a   : > { %1747 = vrot.lane.b32.xlu1 %v1610_v38, %s2883_s20  ;;  %1734 = vrot.lane.b32.xlu0 %v1589_v39, %s2882_s11 }
 0x60e   : > { %1738 = vrot.lane.b32.xlu1 %v1591_v22, %s2882_s11  ;;  %1814 = vrot.lane.b32.xlu0 %v1716_v23, %s2888_s0  ;;  %s2898_s0 = smov 127   ;;  %v1544_v23 = vrot.slane %v1535_v19, %v2242_v8 }
 0x612   : > { %1801 = vrot.lane.b32.xlu1 %v1695_v24, %s2887_s30  ;;  %1788 = vrot.lane.b32.xlu0 %v1674_v25, %s2886_s21  ;;  %v1548_v25 = vmul.f32 %v1544_v23, %v2710_v63 }
 0x616   : > { %1775 = vrot.lane.b32.xlu1 %v1653_v34, %s2885_s24  ;;  %1762 = vrot.lane.b32.xlu0 %v1632_v61, %s2884_s23 }
 0x61a   : > { %1749 = vrot.lane.b32.xlu1 %v1611_v29, %s2883_s20  ;;  %1736 = vrot.lane.b32.xlu0 %v1590_v33, %s2882_s11 }
 0x61e   : > { %1725 = vrot.lane.b32.xlu0 %v1570_v2, %s2898_s0  ;;  %1723 = vrot.lane.b32.xlu1 %v1569_v41, %s2898_s0 }
 0x622   : > { %1901 = vperm.xlu0 %2068, %v1898_v44   ;;  %1721 = vrot.lane.b32.xlu1 %v1568_v36, %s2898_s0 }
 0x626   : > { %1909 = vperm.xlu1 %2058, %v1906_v45  }
 0x664   : > { %v1813_v46 = vpop.permute.xlu0 %1812 }
 0x668   : > { %v1817_v47 = vpop.permute.xlu1 %1816  ;;  %v1804_v48 = vpop.permute.xlu0 %1803 }
 0x66c   : > { %v1800_v49 = vpop.permute.xlu1 %1799  ;;  %v1787_v50 = vpop.permute.xlu0 %1786 }
 0x670   : > { %v1791_v51 = vpop.permute.xlu1 %1790  ;;  %v1778_v52 = vpop.permute.xlu0 %1777 }
 0x674   : > { %v1774_v53 = vpop.permute.xlu1 %1773  ;;  %v1761_v54 = vpop.permute.xlu0 %1760 }
 0x678   : > { %v1765_v55 = vpop.permute.xlu1 %1764  ;;  %v1752_v56 = vpop.permute.xlu0 %1751 }
 0x67c   : > { %v1748_v58 = vpop.permute.xlu1 %1747  ;;  %v1735_v57 = vpop.permute.xlu0 %1734 }
 0x680   : > { %v1739_v59 = vpop.permute.xlu1 %1738  ;;  %v1815_v60 = vpop.permute.xlu0 %1814 }
 0x681   : > { %v1819_v62 = vsel %vm2899_vm1, %v1815_v60, %v1817_v47  ;;  %v1818_v1 = vsel %vm2900_vm4, %v1813_v46, %v1815_v60 }
 0x682   : > { %1841 = vmatprep.subr.mxu1 %v1819_v62 }
 0x683   : > { %1842 = vmatpush1.msra.mxu1 %v1818_v1 }
 0x684   : > { %v1802_v3 = vpop.permute.xlu1 %1801  ;;  %v1789_v4 = vpop.permute.xlu0 %1788 }
 0x685   : > { %v1806_v5 = vsel %vm2901_vm7, %v1802_v3, %v1804_v48  ;;  %v1805_v6 = vsel %vm2902_vm8, %v1800_v49, %v1802_v3  ;;  %v1793_v9 = vsel %vm836_vm15, %v1789_v4, %v1791_v51  ;;  %v1792_v40 = vsel %vm836_vm15, %v1787_v50, %v1789_v4  ;;  %vm2908_vm15 = vmmov %vm2907_vm13 }
 0x686   : > { %1843 = vmatprep.subr.mxu1 %v1806_v5 }
 0x687   : > { %1844 = vmatpush1.msra.mxu1 %v1805_v6 }
 0x688   : > { %v1776_v10 = vpop.permute.xlu1 %1775  ;;  %1845 = vmatprep.subr.mxu1 %v1793_v9  ;;  %v1763_v30 = vpop.permute.xlu0 %1762 }
 0x689   : > { %1846 = vmatpush1.msra.mxu1 %v1792_v40  ;;  %v1780_v11 = vsel %vm822_vm2, %v1776_v10, %v1778_v52  ;;  %v1779_v12 = vsel %vm822_vm2, %v1774_v53, %v1776_v10  ;;  %v1767_v13 = vsel %vm807_vm3, %v1763_v30, %v1765_v55  ;;  %v1766_v16 = vsel %vm807_vm3, %v1761_v54, %v1763_v30 }
 0x68a   : > { %1847 = vmatprep.subr.mxu1 %v1780_v11  ;;  %vm1823_vm2 = vcmask 588800  }
 0x68b   : > { %1848 = vmatpush1.msra.mxu1 %v1779_v12 }
 0x68c   : > { %v1750_v14 = vpop.permute.xlu1 %1749  ;;  %1849 = vmatprep.subr.mxu1 %v1767_v13  ;;  %v1737_v15 = vpop.permute.xlu0 %1736 }
 0x68d   : > { %1850 = vmatpush1.msra.mxu1 %v1766_v16  ;;  %v1754_v17 = vsel %vm2903_vm9, %v1750_v14, %v1752_v56  ;;  %v1753_v18 = vsel %vm2904_vm10, %v1748_v58, %v1750_v14  ;;  %v1741_v39 = vsel %vm2905_vm11, %v1737_v15, %v1739_v59  ;;  %v1740_v21 = vsel %vm2906_vm12, %v1735_v57, %v1737_v15 }
 0x68e   : > { %1851 = vmatprep.subr.mxu1 %v1754_v17 }
 0x68f   : > { %1852 = vmatpush1.msra.mxu1 %v1753_v18 }
 0x690   : > { %v1724_v38 = vpop.permute.xlu1 %1723  ;;  %1853 = vmatprep.subr.mxu1 %v1741_v39  ;;  %v1726_v20 = vpop.permute.xlu0 %1725 }
 0x691   : > { %1854 = vmatpush1.msra.mxu1 %v1740_v21  ;;  %v1728_v22 = vsel %vm2907_vm13, %v1724_v38, %v1726_v20 }
 0x692   : > { %1855 = vmatprep.subr.mxu1 %v1728_v22 }
 0x694   : > { %v1722_v27 = vpop.permute.xlu1 %1721 }
 0x695   : > { %v1727_v24 = vsel %vm2908_vm15, %v1722_v27, %v1724_v38 }
 0x696   : > { %1856 = vmatpush1.msra.mxu1 %v1727_v24 }
 0x697   : > { %1857 = vmatprep.subr.mxu1 %v1548_v25 }
 0x698   : > { %1858 = vmatpush1.msra.mxu1 %v1547_v31 }
 0x699   : > { %2019 = vmatmul.mubr.msk.f32.vlgmr.msra.gmra.mxu1 %vm1823_vm2, %v1822_v32 }
 0x69d   : > { %v1902_v8 = vpop.permute.xlu0 %1901 }
 0x6a1   : > { %v1910_v34 = vpop.permute.xlu1 %1909 }
 0x759   : > { %v1893_v7 = vpop.f32.mrf.mxu1 }
 0x75a   : > { %v1904_v61 = vmul.f32 %v1902_v8, %v1893_v7 }
 0x75b   : > { %v1895_v35 = vpop.f32.mrf.mxu1 }
 0x75c   : > { %v1912_v63 = vadd.f32 %v1910_v34, %v1904_v61  ;;  %v1905_v28 = vmul.f32 %v1902_v8, %v1895_v35 }
 0x75e   : > { %v1913_v29 = vadd.f32 %v1910_v34, %v1905_v28  ;;  %v1916_v0 = vadd.f32 %v2086_v37, %v1912_v63 }
 0x760   : > { %v1917_v33 = vadd.f32 %v1914_v42, %v1913_v29 }
 0x762   : > { %v1920_v43 = vcombine.low %v1916_v0, %v1917_v33 }
 0x764   : > { %1922 = vst [vmem:[%s550_s3] sm:$0xff] %v1920_v43 }
 0x765 PF: > { %s29_s26 = sadd.s32 1, %s2093_s26  }
 0x766   : > { %p26_p4 = scmp.ge.s32.totalorder %s29_s26, 4  }
 0x768   :  { %28 = sbr.rel (!%p26_p4) target bundleno = 10 (0xa), region = 134 }

</bundles_post_ra>
